<compile_context>
chip_gen: v7x
topology: tpu7x:2x2x1
jax: 0.10.0
libtpu: 0.0.40
codegen_flags: <defaults>
</compile_context>

<pallas_src>
import functools

import jax
import jax.numpy as jnp
from jax.experimental import pallas as pl
from jax.experimental.pallas import tpu as pltpu


# ----------------------------------------------------------------------------
# Pallas kernel: fused DCRNN(K=1, H=None) cell + ReLU + Linear head, one tile.
# Nodes live on the lane axis; gates/features live on the sublane axis.
# ----------------------------------------------------------------------------
def _recurrent_gcn_kernel(
    x_ref,     # (F_in, tile_n)  transposed node features
    wg_ref,    # (2T, F_in)      fused [Wz_x | Wh_x]^T
    cb_ref,    # (3T, 1)         fused constants column [bz ; bh ; wlin]
    bl_ref,    # (1, 1)          linear bias (SMEM scalar)
    out_ref,   # (1, tile_n)     lane-dense output row
):
    t = wg_ref.shape[0] // 2

    # Single MXU matmul for both surviving gates: (2T, F_in) @ (F_in, tile_n).
    pre = (
        jnp.dot(wg_ref[...], x_ref[...], preferred_element_type=jnp.float32)
        + cb_ref[: 2 * t, :]                      # gate biases, lane-broadcast
    )                                             # (2T, tile_n)

    # Sublane-aligned gate split (rows 0:T and T:2T) -> full-lane vregs on EUP.
    z = jax.nn.sigmoid(pre[:t, :])                # update gate     (T, tile_n)
    h_tilde = jnp.tanh(pre[t:, :])                # candidate state (T, tile_n)
    h = jnp.maximum((1.0 - z) * h_tilde, 0.0)     # H0 == 0 => Z*H0 vanishes; ReLU

    # Linear head: VPU multiply + sublane reduce -> lane-dense (1, tile_n) row.
    y = jnp.sum(h * cb_ref[2 * t :, :], axis=0, keepdims=True)
    out_ref[...] = (y + bl_ref[0, 0]).astype(out_ref.dtype)


# ----------------------------------------------------------------------------
# Wrapper
# ----------------------------------------------------------------------------
@functools.partial(jax.jit, static_argnames=("tile_n",))
def recurrent_gcn_forward(x, edge_index, edge_weight, params, *, tile_n=16384):
    """Forward pass of RecurrentGCN.

    x:            (N, F_in) node features.
    edge_index:   (2, E) int32 — unused when K=1 (kept for API fidelity).
    edge_weight:  (E,)   f32   — unused when K=1.
    params:       dict of weights (see init_params).
    Returns (N, 1).
    """
    del edge_index, edge_weight  # K=1: diffusion branch never executes.
    n, f_in = x.shape
    t = params["whx"].shape[1]

    # Lane-align the tile and pad the node axis so any N is accepted.
    n_128 = ((n + 127) // 128) * 128
    tile_n = max(128, min(tile_n, n_128))
    tile_n = (tile_n // 128) * 128
    n_pad = ((n + tile_n - 1) // tile_n) * tile_n
    grid_n = n_pad // tile_n

    # Nodes-on-lanes layout: present x^T (F_in, N_pad) to the kernel.
    x_t = x.T
    if n_pad != n:
        x_t = jnp.pad(x_t, ((0, 0), (0, n_pad - n)))

    # Host-side glue: fuse the two surviving x-side gate weights (transposed so
    # the matmul yields (2T, tile_n)), and fold [bz ; bh ; wlin] into a single
    # constants column.  Dead params (wzh/wrh/whh/wrx/br) never reach the kernel.
    w_gate_t = jnp.concatenate([params["wzx"], params["whx"]], axis=1).T  # (2T, F_in)
    consts = jnp.concatenate(
        [
            params["bz"].reshape(t, 1),
            params["bh"].reshape(t, 1),
            params["wlin"].reshape(t, 1),
        ],
        axis=0,
    )                                                                     # (3T, 1)
    blin = params["blin"].reshape(1, 1)                                   # (1, 1)

    out_rows = pl.pallas_call(
        _recurrent_gcn_kernel,
        out_shape=jax.ShapeDtypeStruct((grid_n, tile_n), jnp.float32),
        grid=(grid_n,),
        in_specs=[
            pl.BlockSpec((f_in, tile_n), lambda i: (0, i)),    # x^T tile
            pl.BlockSpec((2 * t, f_in), lambda i: (0, 0)),     # fused gate weight
            pl.BlockSpec((3 * t, 1), lambda i: (0, 0)),        # [bz ; bh ; wlin]
            pl.BlockSpec(memory_space=pltpu.MemorySpace.SMEM), # linear bias scalar
        ],
        out_specs=pl.BlockSpec((1, tile_n), lambda i: (i, 0)),
        compiler_params=pltpu.CompilerParams(
            dimension_semantics=("parallel",),
            vmem_limit_bytes=32 * 1024 * 1024,
        ),
    )(x_t, w_gate_t, consts, blin)

    # Lane-dense rows -> (N, 1); row-major reshape preserves node ordering.
    return out_rows.reshape(n_pad, 1)[:n]


# ----------------------------------------------------------------------------
# Deterministic parameter initialization (shapes from the module's __init__)
# ----------------------------------------------------------------------------
def init_params(key, node_features, time_length):
    """DCRNN(node_features, time_length, K=1) + Linear(time_length, 1)."""
    f_in, t = node_features, time_length
    keys = jax.random.split(key, 8)

    def glorot(k, shape):
        # torch_geometric glorot: uniform(-a, a), a = sqrt(6 / (fan_in + fan_out))
        a = jnp.sqrt(6.0 / (shape[-2] + shape[-1]))
        return jax.random.uniform(k, shape, jnp.float32, -a, a)

    # DConv weight shape in torch: (2, K=1, F_in + T, T); effective weight is
    # W[0,0] + W[1,0].  Pre-sum and split into x-part / h-part (glue).
    def dconv_weights(k):
        w = glorot(k, (2, 1, f_in + t, t))
        w_eff = w[0, 0] + w[1, 0]                # (F_in + T, T)
        return w_eff[:f_in, :], w_eff[f_in:, :]  # (F_in, T), (T, T)

    wzx, wzh = dconv_weights(keys[0])
    wrx, wrh = dconv_weights(keys[1])
    whx, whh = dconv_weights(keys[2])
    bz = jnp.zeros((1, t), jnp.float32)  # DConv bias is zero-initialised
    br = jnp.zeros((1, t), jnp.float32)
    bh = jnp.zeros((1, t), jnp.float32)

    # torch.nn.Linear(time_length, 1): uniform(-1/sqrt(T), 1/sqrt(T))
    bound = 1.0 / jnp.sqrt(jnp.float32(t))
    wlin = jax.random.uniform(keys[3], (t, 1), jnp.float32, -bound, bound)
    blin = jax.random.uniform(keys[4], (1, 1), jnp.float32, -bound, bound)

    return dict(
        wzx=wzx, wzh=wzh, bz=bz,
        wrx=wrx, wrh=wrh, br=br,
        whx=whx, whh=whh, bh=bh,
        wlin=wlin, blin=blin,
    )


# ----------------------------------------------------------------------------
# Pure-JAX reference: FULL GRU math (including the algebraically-dead terms),
# so the kernel's simplifications are checked against the original semantics.
# ----------------------------------------------------------------------------
def reference_forward(x, params):
    n = x.shape[0]
    t = params["wzh"].shape[0]
    h0 = jnp.zeros((n, t), jnp.float32)
    z = jax.nn.sigmoid(x @ params["wzx"] + h0 @ params["wzh"] + params["bz"])
    r = jax.nn.sigmoid(x @ params["wrx"] + h0 @ params["wrh"] + params["br"])
    h_t = jnp.tanh(x @ params["whx"] + (h0 * r) @ params["whh"] + params["bh"])
    h = z * h0 + (1.0 - z) * h_t
    h = jax.nn.relu(h)
    return h @ params["wlin"] + params["blin"]


if __name__ == "__main__":
    key = jax.random.PRNGKey(0)
    k_x, k_p, k_w = jax.random.split(key, 3)

    N = 2048           # number of graph nodes
    NODE_FEATURES = 8  # input features per node
    TIME_LENGTH = 32   # DCRNN hidden size / Linear input size

    x = jax.random.normal(k_x, (N, NODE_FEATURES), jnp.float32)

    # Simple ring graph (unused by the K=1 DConv, kept for interface fidelity).
    src = jnp.arange(N, dtype=jnp.int32)
    dst = jnp.roll(src, -1)
    edge_index = jnp.stack([src, dst], axis=0)                # (2, E)
    edge_weight = jax.random.uniform(k_w, (N,), jnp.float32)  # (E,)

    params = init_params(k_p, NODE_FEATURES, TIME_LENGTH)

    out = recurrent_gcn_forward(x, edge_index, edge_weight, params)
    out = jax.block_until_ready(out)

    ref = reference_forward(x, params)
    assert out.shape == (N, 1)
    assert jnp.allclose(out, ref, atol=1e-5, rtol=1e-5), "mismatch vs reference"

    print("KERNEL_OK")
</pallas_src>

<mosaic_0001>
module attributes {stable_mosaic.version = 11 : i64} {
  func.func @_recurrent_gcn_kernel(%arg0: i32, %arg1: memref<8x2048xf32, #tpu.memory_space<vmem>>, %arg2: memref<64x8xf32, #tpu.memory_space<vmem>>, %arg3: memref<96x1xf32, #tpu.memory_space<vmem>>, %arg4: memref<1x1xf32, #tpu.memory_space<smem>>, %arg5: memref<1x2048xf32, #tpu.memory_space<vmem>>) attributes {dimension_semantics = [#tpu.dimension_semantics<parallel>], iteration_bounds = array<i64: 1>, scalar_prefetch = 0 : i64, scratch_operands = 0 : i64, tpu.core_type = #tpu.core_type<tc>, window_params = [{transform_indices = @transform_0, window_bounds = array<i64: 8, 2048>}, {pipeline_mode = #tpu.pipeline_mode<synchronous>, transform_indices = @transform_1, window_bounds = array<i64: 64, 8>}, {pipeline_mode = #tpu.pipeline_mode<synchronous>, transform_indices = @transform_2, window_bounds = array<i64: 96, 1>}, {transform_indices = @transform_3, window_bounds = array<i64: 1, 1>}, {transform_indices = @transform_4, window_bounds = array<i64: 1, 2048>}]} {
    %c0 = arith.constant 0 : index
    %c0_0 = arith.constant 0 : index
    %0 = vector.load %arg2[%c0, %c0_0] : memref<64x8xf32, #tpu.memory_space<vmem>>, vector<64x8xf32>
    %c0_1 = arith.constant 0 : index
    %c0_2 = arith.constant 0 : index
    %1 = vector.load %arg1[%c0_1, %c0_2] : memref<8x2048xf32, #tpu.memory_space<vmem>>, vector<8x2048xf32>
    %cst = arith.constant dense<0.000000e+00> : vector<64x2048xf32>
    %2 = tpu.matmul %0, %1, %cst {dimension_numbers = #tpu.dot_dimension_numbers<[1], [0], [0], [1], [0, 0, 1, 1], [], []>} : vector<64x8xf32>, vector<8x2048xf32>, vector<64x2048xf32> -> vector<64x2048xf32>
    %c0_3 = arith.constant 0 : index
    %c0_4 = arith.constant 0 : index
    %3 = vector.load %arg3[%c0_3, %c0_4] : memref<96x1xf32, #tpu.memory_space<vmem>>, vector<64x1xf32>
    %4 = vector.broadcast %3 : vector<64x1xf32> to vector<64x2048xf32>
    %5 = arith.addf %2, %4 : vector<64x2048xf32>
    %6 = vector.extract_strided_slice %5 {offsets = [0, 0], sizes = [32, 2048], strides = [1, 1]} : vector<64x2048xf32> to vector<32x2048xf32>
    %7 = arith.negf %6 : vector<32x2048xf32>
    %8 = math.exp %7 : vector<32x2048xf32>
    %cst_5 = arith.constant 1.000000e+00 : f32
    %9 = vector.broadcast %cst_5 : f32 to vector<32x2048xf32>
    %10 = arith.addf %9, %8 : vector<32x2048xf32>
    %11 = arith.divf %9, %10 : vector<32x2048xf32>
    %12 = vector.extract_strided_slice %5 {offsets = [32, 0], sizes = [32, 2048], strides = [1, 1]} : vector<64x2048xf32> to vector<32x2048xf32>
    %13 = math.tanh %12 : vector<32x2048xf32>
    %cst_6 = arith.constant 1.000000e+00 : f32
    %14 = vector.broadcast %cst_6 : f32 to vector<32x2048xf32>
    %15 = arith.subf %14, %11 : vector<32x2048xf32>
    %16 = arith.mulf %15, %13 : vector<32x2048xf32>
    %cst_7 = arith.constant 0.000000e+00 : f32
    %17 = vector.broadcast %cst_7 : f32 to vector<32x2048xf32>
    %18 = arith.maximumf %16, %17 : vector<32x2048xf32>
    %c64 = arith.constant 64 : index
    %c0_8 = arith.constant 0 : index
    %19 = vector.load %arg3[%c64, %c0_8] : memref<96x1xf32, #tpu.memory_space<vmem>>, vector<32x1xf32>
    %20 = vector.broadcast %19 : vector<32x1xf32> to vector<32x2048xf32>
    %21 = arith.mulf %18, %20 : vector<32x2048xf32>
    %cst_9 = arith.constant dense<0.000000e+00> : vector<2048xf32>
    %22 = vector.multi_reduction <add>, %21, %cst_9 [0] : vector<32x2048xf32> to vector<2048xf32>
    %23 = vector.shape_cast %22 : vector<2048xf32> to vector<1x2048xf32>
    %c0_10 = arith.constant 0 : index
    %c0_11 = arith.constant 0 : index
    %24 = memref.load %arg4[%c0_10, %c0_11] : memref<1x1xf32, #tpu.memory_space<smem>>
    %25 = vector.broadcast %24 : f32 to vector<1x2048xf32>
    %26 = arith.addf %23, %25 : vector<1x2048xf32>
    %c0_12 = arith.constant 0 : index
    %c0_13 = arith.constant 0 : index
    %27 = vector.load %arg5[%c0_12, %c0_13] : memref<1x2048xf32, #tpu.memory_space<vmem>>, vector<1x2048xf32>
    tpu.vector_store %arg5[%c0_12, %c0_13], %26 {strides = array<i32>} : memref<1x2048xf32, #tpu.memory_space<vmem>>, vector<1x2048xf32>,
    return
  }
  func.func @transform_0(%arg0: i32) -> (i32, i32) {
    %c0_i32 = arith.constant 0 : i32
    %c0_i32_0 = arith.constant 0 : i32
    return %c0_i32, %arg0 : i32, i32
  }
  func.func @transform_1(%arg0: i32) -> (i32, i32) {
    %c0_i32 = arith.constant 0 : i32
    %c0_i32_0 = arith.constant 0 : i32
    %c0_i32_1 = arith.constant 0 : i32
    return %c0_i32, %c0_i32_0 : i32, i32
  }
  func.func @transform_2(%arg0: i32) -> (i32, i32) {
    %c0_i32 = arith.constant 0 : i32
    %c0_i32_0 = arith.constant 0 : i32
    %c0_i32_1 = arith.constant 0 : i32
    return %c0_i32, %c0_i32_0 : i32, i32
  }
  func.func @transform_3(%arg0: i32) -> (i32, i32) {
    %c0_i32 = arith.constant 0 : i32
    %c0_i32_0 = arith.constant 0 : i32
    %c0_i32_1 = arith.constant 0 : i32
    return %c0_i32, %c0_i32_0 : i32, i32
  }
  func.func @transform_4(%arg0: i32) -> (i32, i32) {
    %c0_i32 = arith.constant 0 : i32
    %c0_i32_0 = arith.constant 0 : i32
    return %arg0, %c0_i32 : i32, i32
  }
}

</mosaic_0001>

<bundles_post_ra>
// kernel: recurrent_gcn_forward.1
= control target key start
LH: loop header
LB: loop body
LE: loop exit
PB: predicated region body
PF: predicated region fallthrough
CT: control target
= control target key end

     0   :  { %vm91_vm0 = vcmask 64512   ;;  %v2584_v5 = vmov 0.0   ;;  %v2585_v14 = vmov 0   ;;  %s4058_s0 = inlined_call_operand.vmem [shape: f32[8,2048], index: 0, kind: input, shape index: {}]   ;;  %s4059_s1 = inlined_call_operand.vmem [shape: f32[64,8], index: 1, kind: input, shape index: {}]   ;;  %s4060_s2 = inlined_call_operand.vmem [shape: f32[96,1], index: 2, kind: input, shape index: {}]   ;;  %s4061_s3 = inlined_call_operand.<no memory space> [shape: f32[1,1], index: 3, kind: input, shape index: {}]   ;;  %s4062_s4 = inlined_call_operand.hbm [shape: f32[1,2048], index: 4, kind: output, shape index: {}]  }
   0x1   :  { %v28_v0 = vld [vmem:[%s4058_s0 + $0x8] sm:$0xff]  ;;  %v30_v1 = vld [vmem:[%s4058_s0 + $0x18] sm:$0xff]  ;;  %v27_v2 = vld [vmem:[%s4058_s0] sm:$0xff]  ;;  %180 = vmatprep.mubr.f32.mxu0 %v2584_v5  ;;  %293 = vmatprep.mubr.f32.mxu1 %v2584_v5 }
   0x2   :  { %116 = vmatprep.subr.mxu0 %v28_v0  ;;  %229 = vmatprep.subr.mxu1 %v30_v1  ;;  %v29_v3 = vld [vmem:[%s4058_s0 + $0x10] sm:$0xff]  ;;  %v2628_v4 = vld [vmem:[%s4059_s1] sm:$0xff]  ;;  %v32_v6 = vld [vmem:[%s4058_s0 + $0x28] sm:$0xff] }
   0x3   :  { %117 = vmatpush1.msra.mxu0 %v27_v2  ;;  %v34_v7 = vld [vmem:[%s4058_s0 + $0x38] sm:$0xff]  ;;  %230 = vmatpush1.msra.mxu1 %v29_v3  ;;  %v31_v8 = vld [vmem:[%s4058_s0 + $0x20] sm:$0xff]  ;;  %v33_v9 = vld [vmem:[%s4058_s0 + $0x30] sm:$0xff] }
   0x4   :  { %2042 = vmatmul.mubr.msk.f32.vlgmr.msra.gmra.mrb[0].mxu0 %vm91_vm0, %v2628_v4  ;;  %2050 = vmatmul.mubr.msk.f32.vlgmr.msra.gmra.mrb[0].mxu1 %vm91_vm0, %v2628_v4  ;;  %v2651_v10 = vld [vmem:[%s4059_s1 + $0x8] sm:$0xff]  ;;  %v38_v12 = vld [vmem:[%s4058_s0 + $0x58] sm:$0xff]  ;;  %v2670_v13 = vld [vmem:[%s4059_s1 + $0x10] sm:$0xff] }
   0x5   :  { %342 = vmatprep.subr.mxu0 %v32_v6  ;;  %455 = vmatprep.subr.mxu1 %v34_v7  ;;  %v36_v11 = vld [vmem:[%s4058_s0 + $0x48] sm:$0xff]  ;;  %v43_v15 = vld [vmem:[%s4060_s2] sm:$0xff]  ;;  %v45_v16 = vld [vmem:[%s4060_s2 + $0x10] sm:$0xff] }
   0x6   :  { %343 = vmatpush1.msra.mxu0 %v31_v8  ;;  %456 = vmatpush1.msra.mxu1 %v33_v9 }
   0x7   :  { %186 = vmatprep.mubr.f32.mxu0 %v2584_v5  ;;  %299 = vmatprep.mubr.f32.mxu1 %v2584_v5 }
   0x8   :  { %2043 = vmatmul.mubr.msk.f32.gmra.mrb[2].mxu0 %vm91_vm0, %v2651_v10  ;;  %2051 = vmatmul.mubr.msk.f32.gmra.mrb[2].mxu1 %vm91_vm0, %v2651_v10 }
   0x9   :  { %192 = vmatprep.mubr.f32.mxu0 %v2584_v5  ;;  %305 = vmatprep.mubr.f32.mxu1 %v2584_v5 }
   0xa   :  { %568 = vmatprep.subr.mxu0 %v36_v11  ;;  %681 = vmatprep.subr.mxu1 %v38_v12 }
   0xb   :  { %2174 = vset.pattern.permute.xlu0 %v2585_v14  ;;  %2175 = vset.pattern.permute.xlu1 %v2585_v14 }
   0xc   :  { %2044 = vmatmul.mubr.msk.f32.gmra.mrb[4].mxu0 %vm91_vm0, %v2670_v13  ;;  %2052 = vmatmul.mubr.msk.f32.gmra.mrb[4].mxu1 %vm91_vm0, %v2670_v13 }
   0xd   :  { %10 = vsyncpa [#allocation4], 0  ;;  %198 = vmatprep.mubr.f32.mxu0 %v2584_v5  ;;  %311 = vmatprep.mubr.f32.mxu1 %v2584_v5  ;;  %v2687_v17 = vld [vmem:[%s4059_s1 + $0x18] sm:$0xff]  ;;  %v44_v18 = vld [vmem:[%s4060_s2 + $0x8] sm:$0xff] }
   0xe   :  { %53 = vperm.xlu0 %2174, %v43_v15   ;;  %63 = vperm.xlu1 %2175, %v45_v16   ;;  %v46_v19 = vld [vmem:[%s4060_s2 + $0x18] sm:$0xff]  ;;  %v2704_v20 = vld [vmem:[%s4059_s1 + $0x20] sm:$0xff]  ;;  %v48_v22 = vld [vmem:[%s4060_s2 + $0x28] sm:$0xff] }
   0xf   :  { %v47_v21 = vld [vmem:[%s4060_s2 + $0x20] sm:$0xff]  ;;  %v2721_v23 = vld [vmem:[%s4059_s1 + $0x28] sm:$0xff]  ;;  %v49_v24 = vld [vmem:[%s4060_s2 + $0x30] sm:$0xff] }
  0x10   :  { %2045 = vmatmul.mubr.msk.f32.gmra.mrb[6].mxu0 %vm91_vm0, %v2687_v17  ;;  %2053 = vmatmul.mubr.msk.f32.gmra.mrb[6].mxu1 %vm91_vm0, %v2687_v17  ;;  %v50_v25 = vld [vmem:[%s4060_s2 + $0x38] sm:$0xff]  ;;  %v2738_v26 = vld [vmem:[%s4059_s1 + $0x30] sm:$0xff]  ;;  %v1660_v27 = vld [vmem:[%s4060_s2 + $0x40] sm:$0xff] }
  0x11   :  { %204 = vmatprep.mubr.f32.mxu0 %v2584_v5  ;;  %317 = vmatprep.mubr.f32.mxu1 %v2584_v5  ;;  %v1661_v28 = vld [vmem:[%s4060_s2 + $0x48] sm:$0xff]  ;;  %v2755_v29 = vld [vmem:[%s4059_s1 + $0x38] sm:$0xff]  ;;  %v1662_v30 = vld [vmem:[%s4060_s2 + $0x50] sm:$0xff] }
  0x12   :  { %58 = vperm.xlu0 %2174, %v44_v18   ;;  %68 = vperm.xlu1 %2175, %v46_v19   ;;  %v1663_v31 = vld [vmem:[%s4060_s2 + $0x58] sm:$0xff]  ;;  %v35_v32 = vld [vmem:[%s4058_s0 + $0x40] sm:$0xff]  ;;  %v37_v33 = vld [vmem:[%s4058_s0 + $0x50] sm:$0xff] }
  0x13   :  { %v40_v34 = vld [vmem:[%s4058_s0 + $0x68] sm:$0xff]  ;;  %v42_v35 = vld [vmem:[%s4058_s0 + $0x78] sm:$0xff]  ;;  %v39_v36 = vld [vmem:[%s4058_s0 + $0x60] sm:$0xff] }
  0x14   :  { %2046 = vmatmul.mubr.msk.f32.gmra.mrb[8].mxu0 %vm91_vm0, %v2704_v20  ;;  %2054 = vmatmul.mubr.msk.f32.gmra.mrb[8].mxu1 %vm91_vm0, %v2704_v20  ;;  %v41_v37 = vld [vmem:[%s4058_s0 + $0x70] sm:$0xff] }
  0x15   :  { %210 = vmatprep.mubr.f32.mxu0 %v2584_v5  ;;  %323 = vmatprep.mubr.f32.mxu1 %v2584_v5 }
  0x16   :  { %73 = vperm.xlu0 %2174, %v47_v21   ;;  %78 = vperm.xlu1 %2175, %v48_v22  }
  0x18   :  { %2047 = vmatmul.mubr.msk.f32.gmra.mrb[10].mxu0 %vm91_vm0, %v2721_v23  ;;  %2055 = vmatmul.mubr.msk.f32.gmra.mrb[10].mxu1 %vm91_vm0, %v2721_v23 }
  0x19   :  { %216 = vmatprep.mubr.f32.mxu0 %v2584_v5  ;;  %329 = vmatprep.mubr.f32.mxu1 %v2584_v5 }
  0x1a   :  { %83 = vperm.xlu0 %2174, %v49_v24   ;;  %88 = vperm.xlu1 %2175, %v50_v25  }
  0x1c   :  { %2048 = vmatmul.mubr.msk.f32.gmra.mrb[12].mxu0 %vm91_vm0, %v2738_v26  ;;  %2056 = vmatmul.mubr.msk.f32.gmra.mrb[12].mxu1 %vm91_vm0, %v2738_v26 }
  0x1d   :  { %222 = vmatprep.mubr.f32.mxu0 %v2584_v5  ;;  %335 = vmatprep.mubr.f32.mxu1 %v2584_v5 }
  0x1e   :  { %1666 = vperm.xlu0 %2174, %v1660_v27   ;;  %1671 = vperm.xlu1 %2175, %v1661_v28  }
  0x20   :  { %2049 = vmatmul.mubr.msk.f32.gmra.mrb[14].mxu0 %vm91_vm0, %v2755_v29  ;;  %2057 = vmatmul.mubr.msk.f32.gmra.mrb[14].mxu1 %vm91_vm0, %v2755_v29 }
  0x21   :  { %406 = vmatprep.mubr.f32.mxu0 %v2584_v5  ;;  %519 = vmatprep.mubr.f32.mxu1 %v2584_v5 }
  0x22   :  { %1676 = vperm.xlu0 %2174, %v1662_v30   ;;  %1681 = vperm.xlu1 %2175, %v1663_v31  }
  0x24   :  { %2058 = vmatmul.mubr.msk.f32.vlgmr.msra.gmra.mrb[16].mxu0 %vm91_vm0, %v2628_v4  ;;  %2066 = vmatmul.mubr.msk.f32.vlgmr.msra.gmra.mrb[16].mxu1 %vm91_vm0, %v2628_v4 }
  0x25   :  { %569 = vmatpush1.msra.mxu0 %v35_v32  ;;  %682 = vmatpush1.msra.mxu1 %v37_v33 }
  0x26   :  { %412 = vmatprep.mubr.f32.mxu0 %v2584_v5  ;;  %525 = vmatprep.mubr.f32.mxu1 %v2584_v5 }
  0x27   :  { %794 = vmatprep.subr.mxu0 %v40_v34  ;;  %907 = vmatprep.subr.mxu1 %v42_v35 }
  0x28   :  { %2059 = vmatmul.mubr.msk.f32.gmra.mrb[18].mxu0 %vm91_vm0, %v2651_v10  ;;  %2067 = vmatmul.mubr.msk.f32.gmra.mrb[18].mxu1 %vm91_vm0, %v2651_v10 }
  0x29   :  { %418 = vmatprep.mubr.f32.mxu0 %v2584_v5  ;;  %531 = vmatprep.mubr.f32.mxu1 %v2584_v5 }
  0x2c   :  { %2060 = vmatmul.mubr.msk.f32.gmra.mrb[20].mxu0 %vm91_vm0, %v2670_v13  ;;  %2068 = vmatmul.mubr.msk.f32.gmra.mrb[20].mxu1 %vm91_vm0, %v2670_v13 }
  0x2d   :  { %424 = vmatprep.mubr.f32.mxu0 %v2584_v5  ;;  %537 = vmatprep.mubr.f32.mxu1 %v2584_v5 }
  0x30   :  { %2061 = vmatmul.mubr.msk.f32.gmra.mrb[22].mxu0 %vm91_vm0, %v2687_v17  ;;  %2069 = vmatmul.mubr.msk.f32.gmra.mrb[22].mxu1 %vm91_vm0, %v2687_v17 }
  0x31   :  { %430 = vmatprep.mubr.f32.mxu0 %v2584_v5  ;;  %543 = vmatprep.mubr.f32.mxu1 %v2584_v5 }
  0x34   :  { %2062 = vmatmul.mubr.msk.f32.gmra.mrb[24].mxu0 %vm91_vm0, %v2704_v20  ;;  %2070 = vmatmul.mubr.msk.f32.gmra.mrb[24].mxu1 %vm91_vm0, %v2704_v20 }
  0x35   :  { %436 = vmatprep.mubr.f32.mxu0 %v2584_v5  ;;  %549 = vmatprep.mubr.f32.mxu1 %v2584_v5 }
  0x38   :  { %2063 = vmatmul.mubr.msk.f32.gmra.mrb[26].mxu0 %vm91_vm0, %v2721_v23  ;;  %2071 = vmatmul.mubr.msk.f32.gmra.mrb[26].mxu1 %vm91_vm0, %v2721_v23 }
  0x39   :  { %442 = vmatprep.mubr.f32.mxu0 %v2584_v5  ;;  %555 = vmatprep.mubr.f32.mxu1 %v2584_v5 }
  0x3c   :  { %2064 = vmatmul.mubr.msk.f32.gmra.mrb[28].mxu0 %vm91_vm0, %v2738_v26  ;;  %2072 = vmatmul.mubr.msk.f32.gmra.mrb[28].mxu1 %vm91_vm0, %v2738_v26 }
  0x3d   :  { %448 = vmatprep.mubr.f32.mxu0 %v2584_v5  ;;  %561 = vmatprep.mubr.f32.mxu1 %v2584_v5 }
  0x40   :  { %2065 = vmatmul.mubr.msk.f32.gmra.mrb[30].mxu0 %vm91_vm0, %v2755_v29  ;;  %2073 = vmatmul.mubr.msk.f32.gmra.mrb[30].mxu1 %vm91_vm0, %v2755_v29 }
  0x41   :  { %632 = vmatprep.mubr.f32.mxu0 %v2584_v5  ;;  %745 = vmatprep.mubr.f32.mxu1 %v2584_v5 }
  0x44   :  { %2074 = vmatmul.mubr.msk.f32.vlgmr.msra.gmra.mrb[32].mxu0 %vm91_vm0, %v2628_v4  ;;  %2082 = vmatmul.mubr.msk.f32.vlgmr.msra.gmra.mrb[32].mxu1 %vm91_vm0, %v2628_v4 }
  0x45   :  { %795 = vmatpush1.msra.mxu0 %v39_v36  ;;  %908 = vmatpush1.msra.mxu1 %v41_v37 }
  0x46   :  { %638 = vmatprep.mubr.f32.mxu0 %v2584_v5  ;;  %751 = vmatprep.mubr.f32.mxu1 %v2584_v5 }
  0x48   :  { %2075 = vmatmul.mubr.msk.f32.gmra.mrb[34].mxu0 %vm91_vm0, %v2651_v10  ;;  %2083 = vmatmul.mubr.msk.f32.gmra.mrb[34].mxu1 %vm91_vm0, %v2651_v10 }
  0x49   :  { %644 = vmatprep.mubr.f32.mxu0 %v2584_v5  ;;  %757 = vmatprep.mubr.f32.mxu1 %v2584_v5 }
  0x4c   :  { %2076 = vmatmul.mubr.msk.f32.gmra.mrb[36].mxu0 %vm91_vm0, %v2670_v13  ;;  %2084 = vmatmul.mubr.msk.f32.gmra.mrb[36].mxu1 %vm91_vm0, %v2670_v13 }
  0x4d   :  { %650 = vmatprep.mubr.f32.mxu0 %v2584_v5  ;;  %763 = vmatprep.mubr.f32.mxu1 %v2584_v5 }
  0x50   :  { %2077 = vmatmul.mubr.msk.f32.gmra.mrb[38].mxu0 %vm91_vm0, %v2687_v17  ;;  %2085 = vmatmul.mubr.msk.f32.gmra.mrb[38].mxu1 %vm91_vm0, %v2687_v17 }
  0x51   :  { %656 = vmatprep.mubr.f32.mxu0 %v2584_v5  ;;  %769 = vmatprep.mubr.f32.mxu1 %v2584_v5 }
  0x54   :  { %2078 = vmatmul.mubr.msk.f32.gmra.mrb[40].mxu0 %vm91_vm0, %v2704_v20  ;;  %2086 = vmatmul.mubr.msk.f32.gmra.mrb[40].mxu1 %vm91_vm0, %v2704_v20 }
  0x55   :  { %662 = vmatprep.mubr.f32.mxu0 %v2584_v5  ;;  %775 = vmatprep.mubr.f32.mxu1 %v2584_v5 }
  0x58   :  { %2079 = vmatmul.mubr.msk.f32.gmra.mrb[42].mxu0 %vm91_vm0, %v2721_v23  ;;  %2087 = vmatmul.mubr.msk.f32.gmra.mrb[42].mxu1 %vm91_vm0, %v2721_v23 }
  0x59   :  { %668 = vmatprep.mubr.f32.mxu0 %v2584_v5  ;;  %781 = vmatprep.mubr.f32.mxu1 %v2584_v5 }
  0x5c   :  { %2080 = vmatmul.mubr.msk.f32.gmra.mrb[44].mxu0 %vm91_vm0, %v2738_v26  ;;  %2088 = vmatmul.mubr.msk.f32.gmra.mrb[44].mxu1 %vm91_vm0, %v2738_v26 }
  0x5d   :  { %674 = vmatprep.mubr.f32.mxu0 %v2584_v5  ;;  %787 = vmatprep.mubr.f32.mxu1 %v2584_v5 }
  0x60   :  { %2081 = vmatmul.mubr.msk.f32.gmra.mrb[46].mxu0 %vm91_vm0, %v2755_v29  ;;  %2089 = vmatmul.mubr.msk.f32.gmra.mrb[46].mxu1 %vm91_vm0, %v2755_v29 }
  0x61   :  { %858 = vmatprep.mubr.f32.mxu0 %v2584_v5  ;;  %971 = vmatprep.mubr.f32.mxu1 %v2584_v5 }
  0x64   :  { %2090 = vmatmul.mubr.msk.f32.vlgmr.msra.gmra.mrb[48].mxu0 %vm91_vm0, %v2628_v4  ;;  %2098 = vmatmul.mubr.msk.f32.vlgmr.msra.gmra.mrb[48].mxu1 %vm91_vm0, %v2628_v4 }
  0x65   :  { %864 = vmatprep.mubr.f32.mxu0 %v2584_v5  ;;  %977 = vmatprep.mubr.f32.mxu1 %v2584_v5 }
  0x68   :  { %2091 = vmatmul.mubr.msk.f32.gmra.mrb[50].mxu0 %vm91_vm0, %v2651_v10  ;;  %2099 = vmatmul.mubr.msk.f32.gmra.mrb[50].mxu1 %vm91_vm0, %v2651_v10 }
  0x69   :  { %870 = vmatprep.mubr.f32.mxu0 %v2584_v5  ;;  %983 = vmatprep.mubr.f32.mxu1 %v2584_v5 }
  0x6c   :  { %2092 = vmatmul.mubr.msk.f32.gmra.mrb[52].mxu0 %vm91_vm0, %v2670_v13  ;;  %2100 = vmatmul.mubr.msk.f32.gmra.mrb[52].mxu1 %vm91_vm0, %v2670_v13 }
  0x6d   :  { %876 = vmatprep.mubr.f32.mxu0 %v2584_v5  ;;  %989 = vmatprep.mubr.f32.mxu1 %v2584_v5 }
  0x70   :  { %2093 = vmatmul.mubr.msk.f32.gmra.mrb[54].mxu0 %vm91_vm0, %v2687_v17  ;;  %2101 = vmatmul.mubr.msk.f32.gmra.mrb[54].mxu1 %vm91_vm0, %v2687_v17 }
  0x71   :  { %882 = vmatprep.mubr.f32.mxu0 %v2584_v5  ;;  %995 = vmatprep.mubr.f32.mxu1 %v2584_v5 }
  0x74   :  { %2094 = vmatmul.mubr.msk.f32.gmra.mrb[56].mxu0 %vm91_vm0, %v2704_v20  ;;  %2102 = vmatmul.mubr.msk.f32.gmra.mrb[56].mxu1 %vm91_vm0, %v2704_v20 }
  0x75   :  { %888 = vmatprep.mubr.f32.mxu0 %v2584_v5  ;;  %1001 = vmatprep.mubr.f32.mxu1 %v2584_v5 }
  0x78   :  { %2095 = vmatmul.mubr.msk.f32.gmra.mrb[58].mxu0 %vm91_vm0, %v2721_v23  ;;  %2103 = vmatmul.mubr.msk.f32.gmra.mrb[58].mxu1 %vm91_vm0, %v2721_v23 }
  0x79   :  { %894 = vmatprep.mubr.f32.mxu0 %v2584_v5  ;;  %1007 = vmatprep.mubr.f32.mxu1 %v2584_v5 }
  0x7c   :  { %2096 = vmatmul.mubr.msk.f32.gmra.mrb[60].mxu0 %vm91_vm0, %v2738_v26  ;;  %2104 = vmatmul.mubr.msk.f32.gmra.mrb[60].mxu1 %vm91_vm0, %v2738_v26 }
  0x7d   :  { %900 = vmatprep.mubr.f32.mxu0 %v2584_v5  ;;  %1013 = vmatprep.mubr.f32.mxu1 %v2584_v5 }
  0x80   :  { %2097 = vmatmul.mubr.msk.f32.gmra.mrb[62].mxu0 %vm91_vm0, %v2755_v29  ;;  %2105 = vmatmul.mubr.msk.f32.gmra.mrb[62].mxu1 %vm91_vm0, %v2755_v29 }
  0x8d   :  { %v2929_v38 = vpop.permute.xlu0 %53  ;;  %v2937_v50 = vpop.permute.xlu1 %63 }
  0x8e   :  { %4091 = vst [vmem:[#allocation6_spill] sm:$0xff] %v2937_v50 }
  0x91   :  { %v2935_v47 = vpop.permute.xlu0 %58  ;;  %v2947_v9 = vpop.permute.xlu1 %68 }
  0x92   :  { %4092 = vst [vmem:[#allocation7_spill] sm:$0xff] %v2947_v9 }
  0xd7   :  { %v182_v39 = vpop.f32.mrb[0].mxu0  ;;  %v295_v40 = vpop.f32.mrb[0].mxu1 }
  0xd8   :  { %v183_v41 = vadd.f32 %v182_v39, %v2929_v38  ;;  %v296_v42 = vadd.f32 %v295_v40, %v2929_v38  ;;  %v184_v43 = vpop.f32.mrb[1].mxu0  ;;  %v297_v44 = vpop.f32.mrb[1].mxu1 }
  0xd9   :  { %v185_v45 = vadd.f32 %v184_v43, %v2929_v38  ;;  %v298_v46 = vadd.f32 %v297_v44, %v2929_v38 }
  0xda   :  { %v2106_v48 = vmul.f32 -1.442695, %v183_v41  ;;  %v2108_v49 = vmul.f32 -1.442695, %v296_v42 }
  0xdb   :  { %v2107_v51 = vmul.f32 -1.442695, %v185_v45  ;;  %v2109_v52 = vmul.f32 -1.442695, %v298_v46  ;;  %v188_v53 = vpop.f32.mrb[2].mxu0  ;;  %v301_v54 = vpop.f32.mrb[2].mxu1 }
  0xdc   :  { %2176 = vpow2.f32 %v2106_v48  ;;  %v189_v55 = vadd.f32 %v188_v53, %v2935_v47  ;;  %v302_v56 = vadd.f32 %v301_v54, %v2935_v47  ;;  %v190_v57 = vpop.f32.mrb[3].mxu0  ;;  %v303_v58 = vpop.f32.mrb[3].mxu1 }
  0xdd   :  { %2178 = vpow2.f32 %v2108_v49  ;;  %v191_v59 = vadd.f32 %v190_v57, %v2935_v47  ;;  %v304_v60 = vadd.f32 %v303_v58, %v2935_v47 }
  0xde   :  { %2180 = vpow2.f32 %v2107_v51  ;;  %v2122_v61 = vmul.f32 -1.442695, %v189_v55  ;;  %v2124_v62 = vmul.f32 -1.442695, %v302_v56 }
  0xdf   :  { %2182 = vpow2.f32 %v2109_v52  ;;  %v2123_v63 = vmul.f32 -1.442695, %v191_v59  ;;  %v2125_v0 = vmul.f32 -1.442695, %v304_v60  ;;  %v194_v1 = vpop.f32.mrb[4].mxu0  ;;  %v307_v2 = vpop.f32.mrb[4].mxu1 }
  0xe0   :  { %2184 = vpow2.f32 %v2122_v61  ;;  %v195_v3 = vadd.f32 %v194_v1, %v2937_v50  ;;  %v308_v4 = vadd.f32 %v307_v2, %v2937_v50  ;;  %v196_v5 = vpop.f32.mrb[5].mxu0  ;;  %v309_v6 = vpop.f32.mrb[5].mxu1 }
  0xe1   :  { %2186 = vpow2.f32 %v2124_v62  ;;  %v197_v7 = vadd.f32 %v196_v5, %v2937_v50  ;;  %v310_v8 = vadd.f32 %v309_v6, %v2937_v50  ;;  %v2967_v1 = vpop.permute.xlu1 %78 }
  0xe2   :  { %2188 = vpow2.f32 %v2123_v63  ;;  %v2138_v10 = vmul.f32 -1.442695, %v195_v3  ;;  %v2140_v11 = vmul.f32 -1.442695, %v308_v4 }
  0xe3   :  { %2190 = vpow2.f32 %v2125_v0  ;;  %v2139_v12 = vmul.f32 -1.442695, %v197_v7  ;;  %v2141_v13 = vmul.f32 -1.442695, %v310_v8  ;;  %v200_v14 = vpop.f32.mrb[6].mxu0  ;;  %v313_v15 = vpop.f32.mrb[6].mxu1 }
  0xe4   :  { %2192 = vpow2.f32 %v2138_v10  ;;  %v201_v16 = vadd.f32 %v200_v14, %v2947_v9  ;;  %v202_v17 = vpop.f32.mrb[7].mxu0  ;;  %v315_v18 = vpop.f32.mrb[7].mxu1  ;;  %v314_v46 = vadd.f32 %v313_v15, %v2947_v9 }
  0xe5   :  { %2194 = vpow2.f32 %v2140_v11  ;;  %v203_v51 = vadd.f32 %v202_v17, %v2947_v9  ;;  %v316_v56 = vadd.f32 %v315_v18, %v2947_v9  ;;  %v2965_v0 = vpop.permute.xlu0 %73  ;;  %v2985_v17 = vpop.permute.xlu1 %88 }
  0xe6   :  { %v2177_v19 = vpop.eup %2176  ;;  %2196 = vpow2.f32 %v2139_v12  ;;  %v2154_v20 = vmul.f32 -1.442695, %v201_v16  ;;  %v2156_v63 = vmul.f32 -1.442695, %v314_v46 }
  0xe7   :  { %v2179_v21 = vpop.eup %2178  ;;  %v1212_v22 = vadd.f32 1.0, %v2177_v19  ;;  %2198 = vpow2.f32 %v2141_v13  ;;  %v2950_v23 = vpop.f32.mrb[8].mxu0  ;;  %v2155_v4 = vmul.f32 -1.442695, %v203_v51  ;;  %v2157_v8 = vmul.f32 -1.442695, %v316_v56 }
  0xe8   :  { %v2181_v24 = vpop.eup %2180  ;;  %v1214_v25 = vadd.f32 1.0, %v2179_v21  ;;  %2200 = vpow2.f32 %v2154_v20  ;;  %v2952_v26 = vpop.f32.mrb[8].mxu1 }
  0xe9   :  { %v208_v27 = vpop.f32.mrb[9].mxu0  ;;  %v2183_v28 = vpop.eup %2182  ;;  %2202 = vrcp.f32 %v1212_v22  ;;  %v1213_v29 = vadd.f32 1.0, %v2181_v24  ;;  %v3014_v46 = vadd.f32 %v2952_v26, %v2965_v0 }
  0xea   :  { %v321_v30 = vpop.f32.mrb[9].mxu1  ;;  %v2185_v31 = vpop.eup %2184  ;;  %2204 = vrcp.f32 %v1214_v25  ;;  %v1215_v32 = vadd.f32 1.0, %v2183_v28  ;;  %v209_v13 = vadd.f32 %v208_v27, %v2965_v0 }
  0xeb   :  { %v2187_v33 = vpop.eup %2186  ;;  %2206 = vrcp.f32 %v1213_v29  ;;  %v1228_v34 = vadd.f32 1.0, %v2185_v31  ;;  %v2954_v35 = vpop.f32.mrb[10].mxu0  ;;  %v322_v15 = vadd.f32 %v321_v30, %v2965_v0  ;;  %4100 = vst [vmem:[#allocation15_spill] sm:$0xff] %v3014_v46 }
  0xec   :  { %v2956_v36 = vpop.f32.mrb[10].mxu1  ;;  %v2189_v37 = vpop.eup %2188  ;;  %2208 = vrcp.f32 %v1215_v32  ;;  %v1230_v39 = vadd.f32 1.0, %v2187_v33 }
  0xed   :  { %v214_v40 = vpop.f32.mrb[11].mxu0  ;;  %v327_v41 = vpop.f32.mrb[11].mxu1  ;;  %2210 = vrcp.f32 %v1228_v34  ;;  %v1229_v43 = vadd.f32 1.0, %v2189_v37  ;;  %v3031_v26 = vadd.f32 %v2956_v36, %v2967_v1 }
  0xee   :  { %v2191_v42 = vpop.eup %2190  ;;  %2212 = vrcp.f32 %v1230_v39  ;;  %v2983_v16 = vpop.permute.xlu0 %83  ;;  %v215_v19 = vadd.f32 %v214_v40, %v2967_v1  ;;  %v328_v24 = vadd.f32 %v327_v41, %v2967_v1  ;;  %v3006_v40 = vadd.f32 %v2950_v23, %v2965_v0 }
  0xef   :  { %v2193_v44 = vpop.eup %2192  ;;  %v1231_v45 = vadd.f32 1.0, %v2191_v42  ;;  %2214 = vrcp.f32 %v1229_v43  ;;  %v2960_v52 = vpop.f32.mrb[12].mxu0  ;;  %4103 = vst [vmem:[#allocation18_spill] sm:$0xff] %v3031_v26 }
  0xf0   :  { %v2195_v48 = vpop.eup %2194  ;;  %v1244_v49 = vadd.f32 1.0, %v2193_v44  ;;  %v2962_v53 = vpop.f32.mrb[12].mxu1  ;;  %4098 = vst [vmem:[#allocation13_spill] sm:$0xff] %v3006_v40 }
  0xf1   :  { %v2197_v54 = vpop.eup %2196  ;;  %2216 = vrcp.f32 %v1231_v45  ;;  %v1246_v55 = vadd.f32 1.0, %v2195_v48  ;;  %v220_v57 = vpop.f32.mrb[13].mxu0 }
  0xf2   :  { %v333_v58 = vpop.f32.mrb[13].mxu1  ;;  %v2199_v59 = vpop.eup %2198  ;;  %2218 = vrcp.f32 %v1244_v49  ;;  %v1245_v60 = vadd.f32 1.0, %v2197_v54  ;;  %v221_v29 = vadd.f32 %v220_v57, %v2983_v16  ;;  %v3021_v54 = vadd.f32 %v2954_v35, %v2967_v1 }
  0xf3   :  { %v2201_v61 = vpop.eup %2200  ;;  %2220 = vrcp.f32 %v1246_v55  ;;  %v1247_v62 = vadd.f32 1.0, %v2199_v59  ;;  %v2971_v5 = vpop.f32.mrb[14].mxu0  ;;  %v334_v32 = vadd.f32 %v333_v58, %v2983_v16  ;;  %v3027_v57 = vadd.f32 %v2960_v52, %v2983_v16 }
  0xf4   :  { %v2969_v2 = vpop.eup %2202  ;;  %2222 = vrcp.f32 %v1245_v60  ;;  %v1260_v3 = vadd.f32 1.0, %v2201_v61  ;;  %v2973_v6 = vpop.f32.mrb[14].mxu1  ;;  %4101 = vst [vmem:[#allocation16_spill] sm:$0xff] %v3021_v54 }
  0xf5   :  { %4093 = vst [vmem:[#allocation8_spill] sm:$0xff] %v2969_v2  ;;  %v2975_v7 = vpop.eup %2204  ;;  %2224 = vrcp.f32 %v1247_v62  ;;  %v226_v10 = vpop.f32.mrb[15].mxu0  ;;  %4102 = vst [vmem:[#allocation17_spill] sm:$0xff] %v3027_v57 }
  0xf6   :  { %4094 = vst [vmem:[#allocation9_spill] sm:$0xff] %v2975_v7  ;;  %v339_v11 = vpop.f32.mrb[15].mxu1  ;;  %v2977_v12 = vpop.eup %2206  ;;  %2226 = vrcp.f32 %v1260_v3  ;;  %v227_v37 = vadd.f32 %v226_v10, %v2985_v17 }
  0xf7   :  { %v2980_v14 = vpop.eup %2208  ;;  %2228 = vpow2.f32 %v2156_v63  ;;  %v408_v20 = vpop.f32.mrb[16].mxu0  ;;  %v340_v42 = vadd.f32 %v339_v11, %v2985_v17  ;;  %v1469_v59 = vsub.f32 1.0, %v2977_v12 }
  0xf8   :  { %v2987_v18 = vpop.eup %2210  ;;  %2230 = vpow2.f32 %v2155_v4  ;;  %v521_v21 = vpop.f32.mrb[16].mxu1  ;;  %v409_v30 = vadd.f32 %v408_v20, %v2929_v38  ;;  %v1471_v60 = vsub.f32 1.0, %v2980_v14 }
  0xf9   :  { %4095 = vst [vmem:[#allocation10_spill] sm:$0xff] %v2987_v18  ;;  %v2990_v22 = vpop.eup %2212  ;;  %2232 = vpow2.f32 %v2157_v8  ;;  %v410_v25 = vpop.f32.mrb[17].mxu0  ;;  %v522_v33 = vadd.f32 %v521_v21, %v2929_v38 }
  0xfa   :  { %4096 = vst [vmem:[#allocation11_spill] sm:$0xff] %v2990_v22  ;;  %v523_v27 = vpop.f32.mrb[17].mxu1  ;;  %v2993_v28 = vpop.eup %2214  ;;  %2234 = vtanh.f32 %v209_v13  ;;  %v411_v43 = vadd.f32 %v410_v25, %v2929_v38  ;;  %v2110_v49 = vmul.f32 -1.442695, %v409_v30 }
  0xfb   :  { %v2997_v31 = vpop.eup %2216  ;;  %2236 = vtanh.f32 %v322_v15  ;;  %v414_v39 = vpop.f32.mrb[18].mxu0  ;;  %v524_v23 = vadd.f32 %v523_v27, %v2929_v38  ;;  %v2112_v56 = vmul.f32 -1.442695, %v522_v33  ;;  %v1485_v63 = vsub.f32 1.0, %v2993_v28 }
  0xfc   :  { %v3001_v34 = vpop.eup %2218  ;;  %2238 = vtanh.f32 %v215_v19  ;;  %v527_v44 = vpop.f32.mrb[18].mxu1  ;;  %v415_v35 = vadd.f32 %v414_v39, %v2935_v47  ;;  %v1487_v52 = vsub.f32 1.0, %v2997_v31  ;;  %v2111_v3 = vmul.f32 -1.442695, %v411_v43 }
  0xfd   :  { %4097 = vst [vmem:[#allocation12_spill] sm:$0xff] %v3001_v34  ;;  %v3008_v41 = vpop.eup %2220  ;;  %2240 = vtanh.f32 %v328_v24  ;;  %v416_v45 = vpop.f32.mrb[19].mxu0  ;;  %v2113_v11 = vmul.f32 -1.442695, %v524_v23  ;;  %v528_v12 = vadd.f32 %v527_v44, %v2935_v47 }
  0xfe   :  { %4099 = vst [vmem:[#allocation14_spill] sm:$0xff] %v3008_v41  ;;  %v3016_v48 = vpop.eup %2222  ;;  %2242 = vtanh.f32 %v221_v29  ;;  %v529_v51 = vpop.f32.mrb[19].mxu1  ;;  %v417_v20 = vadd.f32 %v416_v45, %v2935_v47  ;;  %v2126_v25 = vmul.f32 -1.442695, %v415_v35 }
  0xff   :  { %v3023_v55 = vpop.eup %2224  ;;  %2244 = vtanh.f32 %v334_v32  ;;  %v420_v61 = vpop.f32.mrb[20].mxu0  ;;  %v1501_v15 = vsub.f32 1.0, %v3016_v48  ;;  %v530_v27 = vadd.f32 %v529_v51, %v2935_v47  ;;  %v2128_v43 = vmul.f32 -1.442695, %v528_v12 }
 0x100   :  { %v3033_v58 = vpop.eup %2226  ;;  %2246 = vtanh.f32 %v227_v37  ;;  %v533_v4 = vpop.f32.mrb[20].mxu1  ;;  %v1503_v30 = vsub.f32 1.0, %v3023_v55  ;;  %v421_v32 = vadd.f32 %v420_v61, %v2937_v50  ;;  %v2127_v23 = vmul.f32 -1.442695, %v417_v20 }
 0x101   :  { %4104 = vst [vmem:[#allocation19_spill] sm:$0xff] %v3033_v58  ;;  %v2229_v62 = vpop.eup %2228  ;;  %2248 = vtanh.f32 %v340_v42  ;;  %v422_v36 = vpop.f32.mrb[21].mxu0  ;;  %v534_v44 = vadd.f32 %v533_v4, %v2937_v50  ;;  %v3059_v51 = vadd.f32 %v2962_v53, %v2983_v16 }
 0x102   :  { %v2231_v8 = vpop.eup %2230  ;;  %v1262_v10 = vadd.f32 1.0, %v2229_v62  ;;  %2250 = vpow2.f32 %v2110_v49  ;;  %v535_v13 = vpop.f32.mrb[21].mxu1  ;;  %v423_v4 = vadd.f32 %v422_v36, %v2937_v50  ;;  %v3085_v36 = vadd.f32 %v2973_v6, %v2985_v17 }
 0x103   :  { %v2233_v14 = vpop.eup %2232  ;;  %v1261_v19 = vadd.f32 1.0, %v2231_v8  ;;  %2252 = vpow2.f32 %v2112_v56  ;;  %v426_v28 = vpop.f32.mrb[22].mxu0  ;;  %4108 = vst [vmem:[#allocation23_spill] sm:$0xff] %v3059_v51  ;;  %v536_v12 = vadd.f32 %v535_v13, %v2937_v50 }
 0x104   :  { %v2235_v21 = vpop.eup %2234  ;;  %2254 = vrcp.f32 %v1262_v10  ;;  %v1263_v24 = vadd.f32 1.0, %v2233_v14  ;;  %v539_v33 = vpop.f32.mrb[22].mxu1  ;;  %4113 = vst [vmem:[#allocation28_spill] sm:$0xff] %v3085_v36 }
 0x105   :  { %v2237_v29 = vpop.eup %2236  ;;  %2256 = vrcp.f32 %v1261_v19  ;;  %v3045_v31 = vmul.f32 %v2235_v21, %v1469_v59  ;;  %v3048_v37 = vpop.f32.mrb[23].mxu0  ;;  %v3081_v19 = vadd.f32 %v2971_v5, %v2985_v17  ;;  %v2143_v5 = vmul.f32 -1.442695, %v423_v4 }
 0x106   :  { %v2239_v39 = vpop.eup %2238  ;;  %2258 = vrcp.f32 %v1263_v24  ;;  %v3050_v42 = vmul.f32 %v2237_v29, %v1471_v60  ;;  %v3053_v45 = vpop.f32.mrb[23].mxu1  ;;  %v2129_v60 = vmul.f32 -1.442695, %v530_v27 }
 0x107   :  { %4105 = vst [vmem:[#allocation20_spill] sm:$0xff] %v3045_v31  ;;  %v2241_v48 = vpop.eup %2240  ;;  %v3055_v49 = vmul.f32 %v2239_v39, %v1485_v63  ;;  %2260 = vpow2.f32 %v2111_v3  ;;  %v3064_v35 = vpop.f32.mrb[24].mxu0  ;;  %v2142_v3 = vmul.f32 -1.442695, %v421_v32  ;;  %4112 = vst [vmem:[#allocation27_spill] sm:$0xff] %v3081_v19 }
 0x108   :  { %4106 = vst [vmem:[#allocation21_spill] sm:$0xff] %v3050_v42  ;;  %v2243_v55 = vpop.eup %2242  ;;  %v3062_v59 = vmul.f32 %v2241_v48, %v1487_v52  ;;  %2262 = vpow2.f32 %v2113_v11  ;;  %v3066_v61 = vpop.f32.mrb[24].mxu1  ;;  %v2144_v11 = vmul.f32 -1.442695, %v534_v44  ;;  %v2145_v48 = vmul.f32 -1.442695, %v536_v12 }
 0x109   :  { %4107 = vst [vmem:[#allocation22_spill] sm:$0xff] %v3055_v49  ;;  %v2245_v62 = vpop.eup %2244  ;;  %v3068_v63 = vmul.f32 %v2243_v55, %v1501_v15  ;;  %2264 = vpow2.f32 %v2126_v25  ;;  %v3071_v53 = vpop.f32.mrb[25].mxu0  ;;  %v427_v15 = vadd.f32 %v426_v28, %v2947_v9 }
 0x10a   :  { %4109 = vst [vmem:[#allocation24_spill] sm:$0xff] %v3062_v59  ;;  %v3073_v8 = vpop.f32.mrb[25].mxu1  ;;  %v2247_v10 = vpop.eup %2246  ;;  %v3075_v52 = vmul.f32 %v2245_v62, %v1503_v30  ;;  %2266 = vpow2.f32 %v2128_v43  ;;  %v540_v30 = vadd.f32 %v539_v33, %v2947_v9 }
 0x10b   :  { %4110 = vst [vmem:[#allocation25_spill] sm:$0xff] %v3068_v63  ;;  %v2249_v14 = vpop.eup %2248  ;;  %2268 = vpow2.f32 %v2127_v23  ;;  %v3090_v13 = vpop.f32.mrb[26].mxu0  ;;  %v2158_v62 = vmul.f32 -1.442695, %v427_v15 }
 0x10c   :  { %4111 = vst [vmem:[#allocation26_spill] sm:$0xff] %v3075_v52  ;;  %v2251_v20 = vpop.eup %2250  ;;  %2270 = vpow2.f32 %v2129_v60  ;;  %v3092_v27 = vpop.f32.mrb[26].mxu1  ;;  %v3110_v55 = vmul.f32 -1.442695, %v540_v30 }
 0x10d   :  { %v2253_v28 = vpop.eup %2252  ;;  %v1216_v29 = vadd.f32 1.0, %v2251_v20  ;;  %2272 = vpow2.f32 %v2142_v3  ;;  %v3095_v6 = vpop.f32.mrb[27].mxu0  ;;  %v429_v20 = vadd.f32 %v3048_v37, %v2947_v9 }
 0x10e   :  { %v3097_v32 = vpop.f32.mrb[27].mxu1  ;;  %v3099_v39 = vpop.eup %2254  ;;  %v1218_v44 = vadd.f32 1.0, %v2253_v28  ;;  %2274 = vpow2.f32 %v2144_v11 }
 0x10f   :  { %4114 = vst [vmem:[#allocation29_spill] sm:$0xff] %v3099_v39  ;;  %v2257_v23 = vpop.eup %2256  ;;  %2276 = vrcp.f32 %v1216_v29  ;;  %v444_v25 = vpop.f32.mrb[28].mxu0  ;;  %v2159_v4 = vmul.f32 -1.442695, %v429_v20  ;;  %v3128_v20 = vadd.f32 %v3066_v61, %v2965_v0  ;;  %v3157_v30 = vadd.f32 %v3097_v32, %v2967_v1 }
 0x110   :  { %v2259_v3 = vpop.eup %2258  ;;  %v1517_v33 = vsub.f32 1.0, %v2257_v23  ;;  %2278 = vrcp.f32 %v1218_v44  ;;  %v3107_v43 = vpop.f32.mrb[28].mxu1 }
 0x111   :  { %v2261_v11 = vpop.eup %2260  ;;  %v1519_v12 = vsub.f32 1.0, %v2259_v3  ;;  %2280 = vpow2.f32 %v2143_v5  ;;  %v446_v29 = vpop.f32.mrb[29].mxu0  ;;  %v542_v3 = vadd.f32 %v3053_v45, %v2947_v9 }
 0x112   :  { %v559_v15 = vpop.f32.mrb[29].mxu1  ;;  %v2263_v60 = vpop.eup %2262  ;;  %v3113_v24 = vmul.f32 %v2247_v10, %v1517_v33  ;;  %v1217_v44 = vadd.f32 1.0, %v2261_v11  ;;  %2282 = vpow2.f32 %v2145_v48  ;;  %v3136_v11 = vadd.f32 %v3073_v8, %v2965_v0 }
 0x113   :  { %v2265_v37 = vpop.eup %2264  ;;  %v3115_v21 = vmul.f32 %v2249_v14, %v1519_v12  ;;  %v1219_v56 = vadd.f32 1.0, %v2263_v60  ;;  %2284 = vpow2.f32 %v2158_v62  ;;  %v450_v58 = vpop.f32.mrb[30].mxu0  ;;  %v3123_v14 = vadd.f32 %v3064_v35, %v2965_v0 }
 0x114   :  { %4115 = vst [vmem:[#allocation30_spill] sm:$0xff] %v3113_v24  ;;  %v2267_v5 = vpop.eup %2266  ;;  %2286 = vrcp.f32 %v1217_v44  ;;  %v1232_v28 = vadd.f32 1.0, %v2265_v37  ;;  %v563_v23 = vpop.f32.mrb[30].mxu1  ;;  %v3170_v41 = vadd.f32 %v559_v15, %v2983_v16 }
 0x115   :  { %4116 = vst [vmem:[#allocation31_spill] sm:$0xff] %v3115_v21  ;;  %v2269_v10 = vpop.eup %2268  ;;  %2288 = vrcp.f32 %v1219_v56  ;;  %v1234_v48 = vadd.f32 1.0, %v2267_v5  ;;  %v452_v60 = vpop.f32.mrb[31].mxu0  ;;  %v2161_v56 = vmul.f32 -1.442695, %v542_v3  ;;  %v3132_v5 = vadd.f32 %v3071_v53, %v2965_v0 }
 0x116   :  { %v565_v62 = vpop.f32.mrb[31].mxu1  ;;  %v2271_v45 = vpop.eup %2270  ;;  %2290 = vrcp.f32 %v1232_v28  ;;  %v1233_v12 = vadd.f32 1.0, %v2269_v10  ;;  %v3140_v28 = vadd.f32 %v3090_v13, %v2967_v1  ;;  %v3146_v53 = vadd.f32 %v3092_v27, %v2967_v1 }
 0x117   :  { %v2273_v44 = vpop.eup %2272  ;;  %2292 = vrcp.f32 %v1234_v48  ;;  %v1235_v37 = vadd.f32 1.0, %v2271_v45  ;;  %v634_v61 = vpop.f32.mrb[32].mxu0  ;;  %v3150_v45 = vadd.f32 %v3095_v6, %v2967_v1  ;;  %v3164_v6 = vadd.f32 %v3107_v43, %v2983_v16 }
 0x118   :  { %v2275_v35 = vpop.eup %2274  ;;  %2294 = vrcp.f32 %v1233_v12  ;;  %v1248_v33 = vadd.f32 1.0, %v2273_v44  ;;  %v747_v10 = vpop.f32.mrb[32].mxu1  ;;  %v3176_v43 = vadd.f32 %v450_v58, %v2985_v17  ;;  %v3188_v58 = vadd.f32 %v452_v60, %v2985_v17 }
 0x119   :  { %v3142_v48 = vpop.eup %2276  ;;  %2296 = vrcp.f32 %v1235_v37  ;;  %v1250_v3 = vadd.f32 1.0, %v2275_v35  ;;  %v636_v8 = vpop.f32.mrb[33].mxu0  ;;  %v3160_v37 = vadd.f32 %v444_v25, %v2983_v16  ;;  %v3167_v35 = vadd.f32 %v446_v29, %v2983_v16 }
 0x11a   :  { %v749_v12 = vpop.f32.mrb[33].mxu1  ;;  %v3152_v44 = vpop.eup %2278  ;;  %2298 = vrcp.f32 %v1248_v33  ;;  %v3179_v29 = vadd.f32 %v563_v23, %v2985_v17 }
 0x11b   :  { %v2281_v27 = vpop.eup %2280  ;;  %2300 = vrcp.f32 %v1250_v3  ;;  %v640_v25 = vpop.f32.mrb[34].mxu0  ;;  %v750_v23 = vadd.f32 %v749_v12, %v2929_v38  ;;  %v4119_v59 = vsub.f32 1.0, %v3152_v44 }
 0x11c   :  { %v2283_v33 = vpop.eup %2282  ;;  %v1249_v39 = vadd.f32 1.0, %v2281_v27  ;;  %2302 = vpow2.f32 %v3110_v55  ;;  %v753_v15 = vpop.f32.mrb[34].mxu1  ;;  %v635_v27 = vadd.f32 %v634_v61, %v2929_v38  ;;  %v748_v55 = vadd.f32 %v747_v10, %v2929_v38 }
 0x11d   :  { %v2285_v3 = vpop.eup %2284  ;;  %v1251_v34 = vadd.f32 1.0, %v2283_v33  ;;  %2304 = vpow2.f32 %v2159_v4  ;;  %v642_v22 = vpop.f32.mrb[35].mxu0  ;;  %v637_v4 = vadd.f32 %v636_v8, %v2929_v38  ;;  %v641_v61 = vadd.f32 %v640_v25, %v2935_v47 }
 0x11e   :  { %v3181_v18 = vpop.eup %2286  ;;  %2306 = vrcp.f32 %v1249_v39  ;;  %v1264_v13 = vadd.f32 1.0, %v2285_v3  ;;  %v755_v32 = vpop.f32.mrb[35].mxu1  ;;  %v3195_v39 = vadd.f32 %v565_v62, %v2985_v17  ;;  %v754_v10 = vadd.f32 %v753_v15, %v2935_v47 }
 0x11f   :  { %v3185_v7 = vpop.eup %2288  ;;  %2308 = vrcp.f32 %v1251_v34  ;;  %v646_v3 = vpop.f32.mrb[36].mxu0  ;;  %v643_v8 = vadd.f32 %v642_v22, %v2935_v47  ;;  %v3207_v62 = vmul.f32 -1.442695, %v635_v27  ;;  %v3209_v25 = vmul.f32 -1.442695, %v748_v55 }
 0x120   :  { %v3192_v33 = vpop.eup %2290  ;;  %2310 = vrcp.f32 %v1264_v13  ;;  %v759_v12 = vpop.f32.mrb[36].mxu1  ;;  %v756_v15 = vadd.f32 %v755_v32, %v2935_v47  ;;  %v3216_v22 = vmul.f32 -1.442695, %v637_v4  ;;  %v3224_v27 = vmul.f32 -1.442695, %v641_v61 }
 0x121   :  { %v3199_v2 = vpop.eup %2292  ;;  %2312 = vpow2.f32 %v2161_v56  ;;  %v648_v36 = vpop.f32.mrb[37].mxu0  ;;  %v3218_v56 = vmul.f32 -1.442695, %v750_v23  ;;  %v3226_v32 = vmul.f32 -1.442695, %v754_v10  ;;  %v647_v4 = vadd.f32 %v646_v3, %v2937_v50 }
 0x122   :  { %v3204_v13 = vpop.eup %2294  ;;  %2314 = vtanh.f32 %v3123_v14  ;;  %v761_v19 = vpop.f32.mrb[37].mxu1  ;;  %v3237_v61 = vmul.f32 -1.442695, %v756_v15  ;;  %v760_v10 = vadd.f32 %v759_v12, %v2937_v50 }
 0x123   :  { %v3212_v51 = vpop.eup %2296  ;;  %2316 = vtanh.f32 %v3128_v20  ;;  %v652_v55 = vpop.f32.mrb[38].mxu0  ;;  %v3232_v20 = vmul.f32 -1.442695, %v643_v8  ;;  %v762_v3 = vadd.f32 %v761_v19, %v2937_v50 }
 0x124   :  { %v3220_v34 = vpop.eup %2298  ;;  %2318 = vtanh.f32 %v3132_v5  ;;  %v765_v23 = vpop.f32.mrb[38].mxu1 }
 0x125   :  { %v3228_v57 = vpop.eup %2300  ;;  %2320 = vtanh.f32 %v3136_v11  ;;  %v654_v26 = vpop.f32.mrb[39].mxu0  ;;  %v649_v11 = vadd.f32 %v648_v36, %v2937_v50 }
 0x126   :  { %v2303_v14 = vpop.eup %2302  ;;  %2322 = vtanh.f32 %v3140_v28  ;;  %v767_v54 = vpop.f32.mrb[39].mxu1  ;;  %v653_v28 = vadd.f32 %v652_v55, %v2947_v9  ;;  %v655_v36 = vadd.f32 %v654_v26, %v2947_v9 }
 0x127   :  { %v2305_v46 = vpop.eup %2304  ;;  %v1266_v60 = vadd.f32 1.0, %v2303_v14  ;;  %2324 = vtanh.f32 %v3146_v53  ;;  %v658_v15 = vpop.f32.mrb[40].mxu0  ;;  %v3250_v14 = vmul.f32 -1.442695, %v647_v4  ;;  %v766_v53 = vadd.f32 %v765_v23, %v2947_v9 }
 0x128   :  { %v3243_v8 = vpop.eup %2306  ;;  %v1265_v5 = vadd.f32 1.0, %v2305_v46  ;;  %2326 = vtanh.f32 %v3150_v45  ;;  %v771_v19 = vpop.f32.mrb[40].mxu1  ;;  %v3259_v45 = vmul.f32 -1.442695, %v760_v10  ;;  %v768_v55 = vadd.f32 %v767_v54, %v2947_v9 }
 0x129   :  { %v3248_v12 = vpop.eup %2308  ;;  %2328 = vrcp.f32 %v1266_v60  ;;  %v3254_v21 = vpop.f32.mrb[41].mxu0  ;;  %v3266_v26 = vmul.f32 -1.442695, %v649_v11  ;;  %v3268_v23 = vmul.f32 -1.442695, %v762_v3  ;;  %v4117_v4 = vsub.f32 1.0, %v3142_v48 }
 0x12a   :  { %v3256_v24 = vpop.eup %2310  ;;  %2330 = vrcp.f32 %v1265_v5  ;;  %v3262_v40 = vpop.f32.mrb[41].mxu1  ;;  %v3272_v5 = vmul.f32 -1.442695, %v653_v28  ;;  %v3281_v11 = vmul.f32 -1.442695, %v766_v53 }
 0x12b   :  { %v2313_v60 = vpop.eup %2312  ;;  %2332 = vtanh.f32 %v3157_v30  ;;  %v3274_v54 = vpop.f32.mrb[42].mxu0  ;;  %v3283_v3 = vmul.f32 -1.442695, %v655_v36  ;;  %v3292_v31 = vmul.f32 -1.442695, %v768_v55  ;;  %v3298_v36 = vadd.f32 %v658_v15, %v2965_v0 }
 0x12c   :  { %v2315_v52 = vpop.eup %2314  ;;  %v1267_v46 = vadd.f32 1.0, %v2313_v60  ;;  %2334 = vtanh.f32 %v3160_v37  ;;  %v3276_v10 = vpop.f32.mrb[42].mxu1  ;;  %v3312_v15 = vadd.f32 %v771_v19, %v2965_v0 }
 0x12d   :  { %v2317_v63 = vpop.eup %2316  ;;  %v1536_v30 = vmul.f32 %v2315_v52, %v4117_v4  ;;  %2336 = vtanh.f32 %v3164_v6  ;;  %4118 = vst [vmem:[#allocation32_spill] sm:$0xff] %v3283_v3  ;;  %v3285_v42 = vpop.f32.mrb[43].mxu0  ;;  %4120 = vst [vmem:[#allocation33_spill] sm:$0xff] %v3292_v31  ;;  %v4121_v6 = vsub.f32 1.0, %v3181_v18 }
 0x12e   :  { %v3287_v60 = vpop.f32.mrb[43].mxu1  ;;  %v2319_v37 = vpop.eup %2318  ;;  %2338 = vrcp.f32 %v1267_v46  ;;  %v1538_v49 = vmul.f32 %v2317_v63, %v4119_v59  ;;  %4122 = vst [vmem:[#allocation34_spill] sm:$0xff] %v3298_v36  ;;  %v4123_v46 = vsub.f32 1.0, %v3185_v7  ;;  %4125 = vst [vmem:[#allocation35_spill] sm:$0xff] %v3312_v15 }
 0x12f   :  { %v2321_v52 = vpop.eup %2320  ;;  %v1600_v48 = vmax.f32 %v1536_v30, 0.0  ;;  %v1537_v53 = vmul.f32 %v2319_v37, %v4121_v6  ;;  %2340 = vtanh.f32 %v3167_v35  ;;  %v3304_v59 = vpop.f32.mrb[44].mxu0  ;;  %v4124_v35 = vsub.f32 1.0, %v3192_v33 }
 0x130   :  { %v2323_v4 = vpop.eup %2322  ;;  %v1602_v28 = vmax.f32 %v1538_v49, 0.0  ;;  %v1539_v44 = vmul.f32 %v2321_v52, %v4123_v46  ;;  %2342 = vtanh.f32 %v3170_v41  ;;  %v3306_v63 = vpop.f32.mrb[44].mxu1 }
 0x131   :  { %v2325_v18 = vpop.eup %2324  ;;  %v1601_v55 = vmax.f32 %v1537_v53, 0.0  ;;  %v1552_v30 = vmul.f32 %v2323_v4, %v4124_v35  ;;  %2344 = vtanh.f32 %v3176_v43  ;;  %v3314_v49 = vpop.f32.mrb[45].mxu0  ;;  %v4126_v53 = vsub.f32 1.0, %v3199_v2 }
 0x132   :  { %v3316_v7 = vpop.f32.mrb[45].mxu1  ;;  %v2327_v37 = vpop.eup %2326  ;;  %v1603_v6 = vmax.f32 %v1539_v44, 0.0  ;;  %2346 = vtanh.f32 %v3179_v29  ;;  %v4127_v35 = vsub.f32 1.0, %v3204_v13 }
 0x133   :  { %v3318_v41 = vpop.permute.xlu0 %1666  ;;  %v1554_v46 = vmul.f32 %v2325_v18, %v4126_v53  ;;  %v3324_v33 = vpop.eup %2328  ;;  %v1616_v4 = vmax.f32 %v1552_v30, 0.0  ;;  %2348 = vtanh.f32 %v3188_v58 }
 0x134   :  { %v3326_v43 = vpop.permute.xlu1 %1671  ;;  %v1688_v19 = vmul.f32 %v3318_v41, %v1600_v48  ;;  %v1553_v9 = vmul.f32 %v2327_v37, %v4127_v35  ;;  %v3332_v50 = vpop.eup %2330  ;;  %v1690_v44 = vmul.f32 %v3318_v41, %v1602_v28  ;;  %v1689_v2 = vmul.f32 %v3318_v41, %v1601_v55 }
 0x135   :  { %v1618_v18 = vmax.f32 %v1554_v46, 0.0  ;;  %2350 = vtanh.f32 %v3195_v39  ;;  %v3337_v29 = vpop.f32.mrb[46].mxu0  ;;  %v3339_v53 = vpop.f32.mrb[46].mxu1  ;;  %v1522_v30 = vsub.f32 1.0, %v3324_v33  ;;  %v1704_v13 = vmul.f32 %v3326_v43, %v1616_v4 }
 0x136   :  { %v2333_v48 = vpop.eup %2332  ;;  %v1617_v37 = vmax.f32 %v1553_v9, 0.0  ;;  %2352 = vpow2.f32 %v3207_v62  ;;  %v3344_v58 = vpop.f32.mrb[47].mxu0  ;;  %v1691_v46 = vmul.f32 %v3318_v41, %v1603_v6  ;;  %v4128_v35 = vsub.f32 1.0, %v3212_v51 }
 0x137   :  { %v3346_v28 = vpop.f32.mrb[47].mxu1  ;;  %v2335_v55 = vpop.eup %2334  ;;  %v1706_v39 = vmul.f32 %v3326_v43, %v1618_v18  ;;  %2354 = vpow2.f32 %v3209_v25  ;;  %v1784_v15 = vadd.f32 %v1704_v13, %v1688_v19  ;;  %v4129_v62 = vsub.f32 1.0, %v3220_v34 }
 0x138   :  { %v1555_v52 = vmul.f32 %v2333_v48, %v4128_v35  ;;  %v2337_v33 = vpop.eup %2336  ;;  %v1705_v9 = vmul.f32 %v3326_v43, %v1617_v37  ;;  %2356 = vpow2.f32 %v3216_v22  ;;  %v4130_v6 = vsub.f32 1.0, %v3228_v57  ;;  %v3360_v51 = vpop.f32.mrb[48].mxu0 }
 0x139   :  { %v1568_v4 = vmul.f32 %v2335_v55, %v4129_v62  ;;  %v2339_v36 = vpop.eup %2338  ;;  %v1802_v31 = vadd.f32 %v1706_v39, %v1690_v44  ;;  %2358 = vpow2.f32 %v3218_v56  ;;  %v3362_v25 = vpop.f32.mrb[48].mxu1  ;;  %v1521_v48 = vsub.f32 1.0, %v3332_v50 }
 0x13a   :  { %v1619_v3 = vmax.f32 %v1555_v52, 0.0  ;;  %v1570_v18 = vmul.f32 %v2337_v33, %v4130_v6  ;;  %v2341_v19 = vpop.eup %2340  ;;  %v1793_v13 = vadd.f32 %v1705_v9, %v1689_v2  ;;  %2360 = vpow2.f32 %v3224_v27  ;;  %v3366_v22 = vpop.f32.mrb[49].mxu0 }
 0x13b   :  { %v1632_v34 = vmax.f32 %v1568_v4, 0.0  ;;  %v3368_v44 = vpop.f32.mrb[49].mxu1  ;;  %v2343_v52 = vpop.eup %2342  ;;  %v4132_v55 = vsub.f32 1.0, %v3243_v8  ;;  %2362 = vpow2.f32 %v3226_v32  ;;  %v1523_v2 = vsub.f32 1.0, %v2339_v36 }
 0x13c   :  { %v3370_v57 = vpop.permute.xlu0 %1676  ;;  %v1707_v56 = vmul.f32 %v3326_v43, %v1619_v3  ;;  %v1634_v37 = vmax.f32 %v1570_v18, 0.0  ;;  %v2345_v50 = vpop.eup %2344  ;;  %v4133_v27 = vsub.f32 1.0, %v3248_v12  ;;  %2364 = vpow2.f32 %v3232_v20 }
 0x13d   :  { %4131 = vst [vmem:[#allocation36_spill] sm:$0xff] %v3370_v57  ;;  %v1569_v39 = vmul.f32 %v2341_v19, %v4132_v55  ;;  %v1720_v35 = vmul.f32 %v3370_v57, %v1632_v34  ;;  %v2347_v9 = vpop.eup %2346  ;;  %v4134_v6 = vsub.f32 1.0, %v3256_v24  ;;  %v3383_v18 = vpop.f32.mrb[50].mxu0  ;;  %2366 = vpow2.f32 %v3237_v61 }
 0x13e   :  { %v1571_v33 = vmul.f32 %v2343_v52, %v4133_v27  ;;  %v1811_v62 = vadd.f32 %v1707_v56, %v1691_v46  ;;  %v1722_v4 = vmul.f32 %v3370_v57, %v1634_v37  ;;  %v3385_v32 = vpop.f32.mrb[50].mxu1  ;;  %v2349_v36 = vpop.eup %2348  ;;  %v1586_v55 = vmul.f32 %v2347_v9, %v1522_v30 }
 0x13f   :  { %v1633_v3 = vmax.f32 %v1569_v39, 0.0  ;;  %v1584_v8 = vmul.f32 %v2345_v50, %v4134_v6  ;;  %v1785_v19 = vadd.f32 %v1784_v15, %v1720_v35  ;;  %v3388_v12 = vpop.f32.mrb[51].mxu0  ;;  %v3390_v20 = vpop.f32.mrb[51].mxu1  ;;  %v1585_v37 = vmul.f32 %v2349_v36, %v1521_v48 }
 0x140   :  { %v1635_v34 = vmax.f32 %v1571_v33, 0.0  ;;  %v2351_v46 = vpop.eup %2350  ;;  %v1803_v52 = vadd.f32 %v1802_v31, %v1722_v4  ;;  %v3393_v50 = vpop.permute.xlu1 %1681  ;;  %v1650_v15 = vmax.f32 %v1586_v55, 0.0  ;;  %2368 = vpow2.f32 %v3250_v14 }
 0x141   :  { %v1721_v56 = vmul.f32 %v3370_v57, %v1633_v3  ;;  %v1648_v24 = vmax.f32 %v1584_v8, 0.0  ;;  %v2353_v39 = vpop.eup %2352  ;;  %4135 = vst [vmem:[#allocation37_spill] sm:$0xff] %v3393_v50  ;;  %v1587_v35 = vmul.f32 %v2351_v46, %v1523_v2  ;;  %v1649_v9 = vmax.f32 %v1585_v37, 0.0  ;;  %v3398_v31 = vpop.f32.mrb[52].mxu0 }
 0x142   :  { %v1723_v27 = vmul.f32 %v3370_v57, %v1635_v34  ;;  %v2355_v61 = vpop.eup %2354  ;;  %v1220_v6 = vadd.f32 1.0, %v2353_v39  ;;  %v3400_v4 = vpop.f32.mrb[52].mxu1  ;;  %v1738_v8 = vmul.f32 %v3393_v50, %v1650_v15 }
 0x143   :  { %v1794_v30 = vadd.f32 %v1793_v13, %v1721_v56  ;;  %v1736_v33 = vmul.f32 %v3393_v50, %v1648_v24  ;;  %v2357_v48 = vpop.eup %2356  ;;  %v1651_v36 = vmax.f32 %v1587_v35, 0.0  ;;  %v1222_v34 = vadd.f32 1.0, %v2355_v61  ;;  %v3403_v55 = vpop.f32.mrb[53].mxu0 }
 0x144   :  { %v1812_v3 = vadd.f32 %v1811_v62, %v1723_v27  ;;  %v3405_v2 = vpop.f32.mrb[53].mxu1  ;;  %v2359_v14 = vpop.eup %2358  ;;  %v1737_v46 = vmul.f32 %v3393_v50, %v1649_v9  ;;  %2370 = vrcp.f32 %v1220_v6  ;;  %v1221_v56 = vadd.f32 1.0, %v2357_v48 }
 0x145   :  { %v1786_v13 = vadd.f32 %v1785_v19, %v1736_v33  ;;  %v2361_v24 = vpop.eup %2360  ;;  %v1804_v37 = vadd.f32 %v1803_v52, %v1738_v8  ;;  %v1739_v39 = vmul.f32 %v3393_v50, %v1651_v36  ;;  %2372 = vrcp.f32 %v1222_v34  ;;  %v3413_v57 = vpop.f32.mrb[54].mxu0 }
 0x146   :  { %v1223_v62 = vadd.f32 1.0, %v2359_v14  ;;  %v2363_v27 = vpop.eup %2362  ;;  %v1795_v15 = vadd.f32 %v1794_v30, %v1737_v46  ;;  %2374 = vrcp.f32 %v1221_v56  ;;  %v1236_v35 = vadd.f32 1.0, %v2361_v24  ;;  %v3415_v19 = vpop.f32.mrb[54].mxu1 }
 0x147   :  { %v3411_v61 = vadd.f32 %v3254_v21, %v2965_v0  ;;  %v2365_v33 = vpop.eup %2364  ;;  %v1813_v9 = vadd.f32 %v1812_v3, %v1739_v39  ;;  %v1238_v52 = vadd.f32 1.0, %v2363_v27  ;;  %v3419_v6 = vadd.f32 %v3262_v40, %v2965_v0  ;;  %v3421_v48 = vpop.f32.mrb[55].mxu0 }
 0x148   :  { %2376 = vrcp.f32 %v1223_v62  ;;  %v3423_v30 = vpop.f32.mrb[55].mxu1  ;;  %v1787_v8 = vrot.slane %v1786_v13, 4  ;;  %v1805_v36 = vrot.slane %v1804_v37, 4  ;;  %v1237_v21 = vadd.f32 1.0, %v2365_v33  ;;  %v2367_v34 = vpop.eup %2366 }
 0x149   :  { %2378 = vrcp.f32 %v1236_v35  ;;  %v1796_v14 = vrot.slane %v1795_v15, 4  ;;  %v3427_v3 = vadd.f32 %v3274_v54, %v2967_v1  ;;  %v3431_v46 = vadd.f32 %v3276_v10, %v2967_v1  ;;  %v3437_v39 = vpop.f32.mrb[56].mxu0  ;;  %v3439_v62 = vpop.f32.mrb[56].mxu1 }
 0x14a   :  { %2380 = vrcp.f32 %v1238_v52  ;;  %v1814_v40 = vrot.slane %v1813_v9, 4  ;;  %v1239_v56 = vadd.f32 1.0, %v2367_v34  ;;  %v3435_v24 = vadd.f32 %v3285_v42, %v2967_v1  ;;  %v2369_v27 = vpop.eup %2368  ;;  %v3454_v42 = vpop.f32.mrb[57].mxu0 }
 0x14b   :  { %2382 = vrcp.f32 %v1237_v21  ;;  %v3444_v54 = vadd.f32 %v3287_v60, %v2967_v1  ;;  %v3448_v10 = vadd.f32 %v3304_v59, %v2983_v16  ;;  %v3452_v35 = vadd.f32 %v3306_v63, %v2983_v16  ;;  %v3456_v33 = vpop.f32.mrb[57].mxu1 }
 0x14c   :  { %2384 = vpow2.f32 %v3259_v45  ;;  %v3458_v52 = vadd.f32 %v1787_v8, %v1786_v13  ;;  %v3460_v21 = vadd.f32 %v1805_v36, %v1804_v37  ;;  %v1252_v45 = vadd.f32 1.0, %v2369_v27 }
 0x14d   :  { %2386 = vrcp.f32 %v1239_v56  ;;  %v3462_v60 = vadd.f32 %v1796_v14, %v1795_v15  ;;  %v3467_v59 = vadd.f32 %v3314_v49, %v2983_v16  ;;  %v861_v63 = vadd.f32 %v3360_v51, %v2929_v38  ;;  %v3483_v15 = vpop.f32.mrb[58].mxu1 }
 0x14e   :  { %4136 = vst [vmem:[#allocation38_spill] sm:$0xff] %v3458_v52  ;;  %4137 = vst [vmem:[#allocation39_spill] sm:$0xff] %v3460_v21  ;;  %2388 = vpow2.f32 %v3266_v26  ;;  %v3471_v34 = vpop.eup %2370  ;;  %v3473_v50 = vadd.f32 %v1814_v40, %v1813_v9  ;;  %v3477_v13 = vadd.f32 %v3316_v7, %v2983_v16  ;;  %v974_v37 = vadd.f32 %v3362_v25, %v2929_v38  ;;  %v3481_v26 = vpop.f32.mrb[58].mxu0  ;;  %v4140_v40 = vld [vmem:[#allocation32_spill] sm:$0xff]  ;;  %v4145_v21 = vld [vmem:[#allocation34_spill] sm:$0xff] }
 0x14f   :  { %4138 = vst [vmem:[#allocation40_spill] sm:$0xff] %v3462_v60  ;;  %2390 = vrcp.f32 %v1252_v45  ;;  %v3485_v49 = vpop.eup %2372  ;;  %v3490_v51 = vadd.f32 %v3337_v29, %v2985_v17  ;;  %v863_v9 = vadd.f32 %v3366_v22, %v2929_v38  ;;  %v976_v7 = vadd.f32 %v3368_v44, %v2929_v38  ;;  %v3496_v8 = vpop.f32.mrb[59].mxu0  ;;  %v4142_v45 = vld [vmem:[#allocation33_spill] sm:$0xff] }
 0x150   :  { %4139 = vst [vmem:[#allocation41_spill] sm:$0xff] %v3473_v50  ;;  %2392 = vpow2.f32 %v3268_v23  ;;  %v3498_v25 = vpop.eup %2374  ;;  %v3503_v36 = vadd.f32 %v3339_v53, %v2985_v17  ;;  %v3507_v23 = vadd.f32 %v3344_v58, %v2985_v17  ;;  %v867_v29 = vadd.f32 %v3383_v18, %v2935_v47  ;;  %v3511_v22 = vpop.f32.mrb[59].mxu1 }
 0x151   :  { %2394 = vpow2.f32 %v3272_v5  ;;  %v3518_v5 = vadd.f32 %v3346_v28, %v2985_v17  ;;  %v3520_v44 = vmul.f32 -1.442695, %v861_v63  ;;  %v980_v53 = vadd.f32 %v3385_v32, %v2935_v47  ;;  %v3533_v27 = vpop.f32.mrb[60].mxu1 }
 0x152   :  { %v3513_v38 = vpop.eup %2376  ;;  %2396 = vpow2.f32 %v3281_v11  ;;  %v3529_v56 = vmul.f32 -1.442695, %v974_v37  ;;  %v3531_v11 = vpop.f32.mrb[60].mxu0  ;;  %v3538_v63 = vmul.f32 -1.442695, %v863_v9  ;;  %v869_v14 = vadd.f32 %v3388_v12, %v2935_v47  ;;  %v4149_v12 = vld [vmem:[#allocation6_spill] sm:$0xff] }
 0x153   :  { %v3524_v58 = vpop.eup %2378  ;;  %2398 = vpow2.f32 %v4140_v40  ;;  %v3540_v32 = vmul.f32 -1.442695, %v976_v7  ;;  %v3544_v18 = vpop.f32.mrb[61].mxu0  ;;  %v3552_v60 = vmul.f32 -1.442695, %v867_v29  ;;  %v982_v9 = vadd.f32 %v3390_v20, %v2935_v47 }
 0x154   :  { %4141 = vst [vmem:[#allocation32_spill] sm:$0xff] %v3529_v56  ;;  %v3535_v28 = vpop.eup %2380  ;;  %2400 = vpow2.f32 %v4142_v45  ;;  %4143 = vst [vmem:[#allocation33_spill] sm:$0xff] %v3538_v63  ;;  %v3546_v40 = vpop.f32.mrb[61].mxu1  ;;  %v4147_v45 = vld [vmem:[#allocation35_spill] sm:$0xff]  ;;  %v3557_v52 = vmul.f32 -1.442695, %v980_v53  ;;  %v986_v63 = vadd.f32 %v3400_v4, %v4149_v12  ;;  %v875_v4 = vadd.f32 %v3403_v55, %v4149_v12 }
 0x155   :  { %4144 = vst [vmem:[#allocation42_spill] sm:$0xff] %v3540_v32  ;;  %v3548_v37 = vpop.eup %2382  ;;  %2402 = vtanh.f32 %v4145_v21  ;;  %4146 = vst [vmem:[#allocation34_spill] sm:$0xff] %v3552_v60  ;;  %v873_v32 = vadd.f32 %v3398_v31, %v4149_v12  ;;  %v3568_v47 = vpop.f32.mrb[62].mxu0  ;;  %v3574_v31 = vmul.f32 -1.442695, %v869_v14  ;;  %v988_v55 = vadd.f32 %v3405_v2, %v4149_v12 }
 0x156   :  { %v2385_v7 = vpop.eup %2384  ;;  %2404 = vtanh.f32 %v4147_v45  ;;  %4148 = vst [vmem:[#allocation35_spill] sm:$0xff] %v3557_v52  ;;  %v3570_v20 = vpop.f32.mrb[62].mxu1  ;;  %v3585_v60 = vmul.f32 -1.442695, %v982_v9  ;;  %v3590_v14 = vmul.f32 -1.442695, %v986_v63 }
 0x157   :  { %v3563_v56 = vpop.eup %2386  ;;  %v1254_v50 = vadd.f32 1.0, %v2385_v7  ;;  %2406 = vtanh.f32 %v3411_v61  ;;  %4150 = vst [vmem:[#allocation6_spill] sm:$0xff] %v3574_v31  ;;  %v3578_v21 = vpop.f32.mrb[63].mxu0  ;;  %v4153_v31 = vld [vmem:[#allocation7_spill] sm:$0xff]  ;;  %v3600_v63 = vmul.f32 -1.442695, %v875_v4 }
 0x158   :  { %v2389_v53 = vpop.eup %2388  ;;  %2408 = vtanh.f32 %v3419_v6  ;;  %4151 = vst [vmem:[#allocation43_spill] sm:$0xff] %v3578_v21  ;;  %v3580_v29 = vpop.f32.mrb[63].mxu1  ;;  %v3588_v6 = vmul.f32 -1.442695, %v873_v32  ;;  %v879_v61 = vadd.f32 %v3413_v57, %v4153_v31  ;;  %v994_v57 = vadd.f32 %v3423_v30, %v4153_v31 }
 0x159   :  { %4152 = vst [vmem:[#allocation44_spill] sm:$0xff] %v3580_v29  ;;  %v3582_v7 = vpop.eup %2390  ;;  %2410 = vrcp.f32 %v1254_v50  ;;  %v1253_v52 = vadd.f32 1.0, %v2389_v53  ;;  %v992_v50 = vadd.f32 %v3415_v19, %v4153_v31  ;;  %4154 = vst [vmem:[#allocation7_spill] sm:$0xff] %v3600_v63  ;;  %v3607_v53 = vmul.f32 -1.442695, %v988_v55 }
 0x15a   :  { %v2393_v45 = vpop.eup %2392  ;;  %2412 = vtanh.f32 %v3427_v3  ;;  %v1508_v19 = vsub.f32 1.0, %v3582_v7  ;;  %v3609_v4 = vmul.f32 -1.442695, %v879_v61  ;;  %v3617_v30 = vadd.f32 %v3437_v39, %v2965_v0 }
 0x15b   :  { %v2395_v21 = vpop.eup %2394  ;;  %2414 = vrcp.f32 %v1253_v52  ;;  %v1255_v29 = vadd.f32 1.0, %v2393_v45  ;;  %v881_v52 = vadd.f32 %v3421_v48, %v4153_v31  ;;  %v4155_v48 = vsub.f32 1.0, %v3471_v34 }
 0x15c   :  { %v2397_v9 = vpop.eup %2396  ;;  %v1268_v3 = vadd.f32 1.0, %v2395_v21  ;;  %2416 = vtanh.f32 %v3431_v46  ;;  %v3621_v31 = vadd.f32 %v3439_v62, %v2965_v0  ;;  %v4156_v61 = vsub.f32 1.0, %v3485_v49 }
 0x15d   :  { %v2399_v32 = vpop.eup %2398  ;;  %2418 = vrcp.f32 %v1255_v29  ;;  %v1270_v2 = vadd.f32 1.0, %v2397_v9  ;;  %v3611_v29 = vmul.f32 -1.442695, %v992_v50  ;;  %v3625_v50 = vmul.f32 -1.442695, %v881_v52 }
 0x15e   :  { %v2401_v12 = vpop.eup %2400  ;;  %2420 = vrcp.f32 %v1268_v3  ;;  %v1269_v45 = vadd.f32 1.0, %v2399_v32  ;;  %v3627_v32 = vmul.f32 -1.442695, %v994_v57  ;;  %v4157_v34 = vsub.f32 1.0, %v3498_v25 }
 0x15f   :  { %v2403_v21 = vpop.eup %2402  ;;  %2422 = vrcp.f32 %v1270_v2  ;;  %v1271_v46 = vadd.f32 1.0, %v2401_v12  ;;  %v3634_v39 = vadd.f32 %v3454_v42, %v2965_v0  ;;  %v3638_v62 = vadd.f32 %v3456_v33, %v2965_v0 }
 0x160   :  { %v2405_v9 = vpop.eup %2404  ;;  %2424 = vrcp.f32 %v1269_v45  ;;  %v1540_v63 = vmul.f32 %v2403_v21, %v4155_v48  ;;  %v4158_v52 = vsub.f32 1.0, %v3513_v38  ;;  %v3647_v25 = vadd.f32 %v3481_v26, %v2967_v1 }
 0x161   :  { %v2407_v55 = vpop.eup %2406  ;;  %2426 = vrcp.f32 %v1271_v46  ;;  %v1542_v3 = vmul.f32 %v2405_v9, %v4156_v61  ;;  %v3656_v0 = vadd.f32 %v3496_v8, %v2967_v1  ;;  %v3660_v33 = vadd.f32 %v3511_v22, %v2967_v1 }
 0x162   :  { %v2409_v2 = vpop.eup %2408  ;;  %v1541_v12 = vmul.f32 %v2407_v55, %v4157_v34  ;;  %2428 = vtanh.f32 %v3435_v24  ;;  %v3651_v24 = vadd.f32 %v3483_v15, %v2967_v1  ;;  %v1604_v45 = vmax.f32 %v1540_v63, 0.0 }
 0x163   :  { %v3640_v49 = vpop.eup %2410  ;;  %v1543_v57 = vmul.f32 %v2409_v2, %v4158_v52  ;;  %2430 = vtanh.f32 %v3444_v54  ;;  %v1606_v26 = vmax.f32 %v1542_v3, 0.0  ;;  %v4159_v38 = vsub.f32 1.0, %v3524_v58 }
 0x164   :  { %v2413_v42 = vpop.eup %2412  ;;  %2432 = vtanh.f32 %v3448_v10  ;;  %v3669_v15 = vadd.f32 %v3531_v11, %v2983_v16  ;;  %v1605_v63 = vmax.f32 %v1541_v12, 0.0  ;;  %v3674_v1 = vadd.f32 %v3533_v27, %v2983_v16 }
 0x165   :  { %v3662_v54 = vpop.eup %2414  ;;  %v1556_v21 = vmul.f32 %v2413_v42, %v4159_v38  ;;  %2434 = vtanh.f32 %v3452_v35  ;;  %v3678_v8 = vadd.f32 %v3544_v18, %v2983_v16  ;;  %v1607_v58 = vmax.f32 %v1543_v57, 0.0 }
 0x166   :  { %v2417_v10 = vpop.eup %2416  ;;  %2436 = vtanh.f32 %v3467_v59  ;;  %v4160_v35 = vsub.f32 1.0, %v3535_v28  ;;  %v1510_v48 = vsub.f32 1.0, %v3640_v49  ;;  %v1692_v59 = vmul.f32 %v3318_v41, %v1604_v45 }
 0x167   :  { %v2419_v22 = vpop.eup %2418  ;;  %v1620_v46 = vmax.f32 %v1556_v21, 0.0  ;;  %2438 = vtanh.f32 %v3477_v13  ;;  %v3688_v27 = vadd.f32 %v3546_v40, %v2983_v16  ;;  %v1694_v55 = vmul.f32 %v3318_v41, %v1606_v26  ;;  %v4162_v26 = vld [vmem:[#allocation32_spill] sm:$0xff] }
 0x168   :  { %v1558_v9 = vmul.f32 %v2417_v10, %v4160_v35  ;;  %v2421_v11 = vpop.eup %2420  ;;  %2440 = vtanh.f32 %v3490_v51  ;;  %v1509_v3 = vsub.f32 1.0, %v3662_v54  ;;  %v1693_v2 = vmul.f32 %v3318_v41, %v1605_v63  ;;  %v4164_v63 = vld [vmem:[#allocation33_spill] sm:$0xff] }
 0x169   :  { %v2423_v18 = vpop.eup %2422  ;;  %v1708_v61 = vmul.f32 %v3326_v43, %v1620_v46  ;;  %2442 = vtanh.f32 %v3503_v36  ;;  %v3698_v51 = vadd.f32 %v3568_v47, %v2985_v17  ;;  %v1695_v40 = vmul.f32 %v3318_v41, %v1607_v58 }
 0x16a   :  { %v1622_v28 = vmax.f32 %v1558_v9, 0.0  ;;  %v2425_v13 = vpop.eup %2424  ;;  %2444 = vtanh.f32 %v3507_v23  ;;  %v1511_v49 = vsub.f32 1.0, %v2419_v22  ;;  %v1524_v52 = vsub.f32 1.0, %v2421_v11  ;;  %v4167_v9 = vld [vmem:[#allocation42_spill] sm:$0xff] }
 0x16b   :  { %v2427_v16 = vpop.eup %2426  ;;  %v1820_v34 = vadd.f32 %v1708_v61, %v1692_v59  ;;  %2446 = vtanh.f32 %v3518_v5  ;;  %v3706_v23 = vadd.f32 %v3570_v20, %v2985_v17  ;;  %v1526_v47 = vsub.f32 1.0, %v2423_v18 }
 0x16c   :  { %v1710_v12 = vmul.f32 %v3326_v43, %v1622_v28  ;;  %v2429_v36 = vpop.eup %2428  ;;  %2448 = vpow2.f32 %v3520_v44  ;;  %v4161_v45 = vsub.f32 1.0, %v3548_v37  ;;  %v1525_v21 = vsub.f32 1.0, %v2425_v13  ;;  %v4165_v44 = vld [vmem:[#allocation20_spill] sm:$0xff] }
 0x16d   :  { %v2431_v57 = vpop.eup %2430  ;;  %2450 = vpow2.f32 %v4162_v26  ;;  %v4163_v5 = vsub.f32 1.0, %v3563_v56  ;;  %v4166_v22 = vmax.f32 %v4165_v44, 0.0  ;;  %v1527_v46 = vsub.f32 1.0, %v2427_v16  ;;  %v4168_v56 = vld [vmem:[#allocation34_spill] sm:$0xff] }
 0x16e   :  { %v1838_v42 = vadd.f32 %v1710_v12, %v1694_v55  ;;  %v1557_v54 = vmul.f32 %v2429_v36, %v4161_v45  ;;  %v2433_v38 = vpop.eup %2432  ;;  %2452 = vpow2.f32 %v4164_v63  ;;  %v4169_v55 = vld [vmem:[#allocation22_spill] sm:$0xff] }
 0x16f   :  { %v1559_v10 = vmul.f32 %v2431_v57, %v4163_v5  ;;  %v3717_v20 = vmul.f32 %v3318_v41, %v4166_v22  ;;  %v2435_v58 = vpop.eup %2434  ;;  %v1572_v37 = vmul.f32 %v2433_v38, %v1508_v19  ;;  %2454 = vpow2.f32 %v4167_v9  ;;  %v4171_v57 = vld [vmem:[#allocation35_spill] sm:$0xff]  ;;  %v4173_v5 = vld [vmem:[#allocation36_spill] sm:$0xff] }
 0x170   :  { %v1621_v35 = vmax.f32 %v1557_v54, 0.0  ;;  %v2437_v11 = vpop.eup %2436  ;;  %v1574_v18 = vmul.f32 %v2435_v58, %v1510_v48  ;;  %2456 = vpow2.f32 %v4168_v56  ;;  %v4170_v61 = vmax.f32 %v4169_v55, 0.0  ;;  %v4172_v48 = vld [vmem:[#allocation6_spill] sm:$0xff] }
 0x171   :  { %v1623_v59 = vmax.f32 %v1559_v10, 0.0  ;;  %v2439_v13 = vpop.eup %2438  ;;  %v1636_v16 = vmax.f32 %v1572_v37, 0.0  ;;  %v1573_v36 = vmul.f32 %v2437_v11, %v1509_v3  ;;  %2458 = vpow2.f32 %v4171_v57 }
 0x172   :  { %v3726_v28 = vmul.f32 %v3326_v43, %v4170_v61  ;;  %v1709_v12 = vmul.f32 %v3326_v43, %v1621_v35  ;;  %v2441_v7 = vpop.eup %2440  ;;  %v1638_v45 = vmax.f32 %v1574_v18, 0.0  ;;  %v1575_v54 = vmul.f32 %v2439_v13, %v1511_v49 }
 0x173   :  { %v1711_v19 = vmul.f32 %v3326_v43, %v1623_v59  ;;  %2460 = vpow2.f32 %v4172_v48  ;;  %v2443_v26 = vpop.eup %2442  ;;  %v1724_v10 = vmul.f32 %v4173_v5, %v1636_v16  ;;  %v1637_v63 = vmax.f32 %v1573_v36, 0.0  ;;  %v4174_v16 = vld [vmem:[#allocation37_spill] sm:$0xff] }
 0x174   :  { %v1829_v38 = vadd.f32 %v1709_v12, %v1693_v2  ;;  %v1588_v44 = vmul.f32 %v2441_v7, %v1524_v52  ;;  %v2445_v22 = vpop.eup %2444  ;;  %v1726_v35 = vmul.f32 %v4173_v5, %v1638_v45  ;;  %v1639_v3 = vmax.f32 %v1575_v54, 0.0 }
 0x175   :  { %v1847_v58 = vadd.f32 %v1711_v19, %v1695_v40  ;;  %v1590_v37 = vmul.f32 %v2443_v26, %v1526_v47  ;;  %v2447_v9 = vpop.eup %2446  ;;  %v1821_v11 = vadd.f32 %v1820_v34, %v1724_v10  ;;  %v1725_v59 = vmul.f32 %v4173_v5, %v1637_v63 }
 0x176   :  { %v1652_v18 = vmax.f32 %v1588_v44, 0.0  ;;  %v1589_v49 = vmul.f32 %v2445_v22, %v1525_v21  ;;  %v2449_v56 = vpop.eup %2448  ;;  %v1839_v55 = vadd.f32 %v1838_v42, %v1726_v35  ;;  %v1727_v2 = vmul.f32 %v4173_v5, %v1639_v3 }
 0x177   :  { %v1654_v61 = vmax.f32 %v1590_v37, 0.0  ;;  %v1591_v13 = vmul.f32 %v2447_v9, %v1527_v46  ;;  %v2451_v12 = vpop.eup %2450  ;;  %v1830_v52 = vadd.f32 %v1829_v38, %v1725_v59  ;;  %v1224_v57 = vadd.f32 1.0, %v2449_v56  ;;  %v4177_v59 = vld [vmem:[#allocation25_spill] sm:$0xff] }
 0x178   :  { %v1740_v40 = vmul.f32 %v4174_v16, %v1652_v18  ;;  %v1653_v36 = vmax.f32 %v1589_v49, 0.0  ;;  %v2453_v7 = vpop.eup %2452  ;;  %v1848_v47 = vadd.f32 %v1847_v58, %v1727_v2  ;;  %v1226_v45 = vadd.f32 1.0, %v2451_v12  ;;  %v4175_v58 = vld [vmem:[#allocation24_spill] sm:$0xff] }
 0x179   :  { %v1742_v34 = vmul.f32 %v4174_v16, %v1654_v61  ;;  %v1655_v19 = vmax.f32 %v1591_v13, 0.0  ;;  %v2455_v54 = vpop.eup %2454  ;;  %2462 = vrcp.f32 %v1224_v57  ;;  %v1225_v48 = vadd.f32 1.0, %v2453_v7  ;;  %v4181_v13 = vld [vmem:[#allocation26_spill] sm:$0xff]  ;;  %v4185_v7 = vld [vmem:[#allocation31_spill] sm:$0xff] }
 0x17a   :  { %v1822_v21 = vadd.f32 %v1821_v11, %v1740_v40  ;;  %v1741_v42 = vmul.f32 %v4174_v16, %v1653_v36  ;;  %v2457_v26 = vpop.eup %2456  ;;  %2464 = vrcp.f32 %v1226_v45  ;;  %v1227_v10 = vadd.f32 1.0, %v2455_v54  ;;  %v4183_v40 = vld [vmem:[#allocation30_spill] sm:$0xff] }
 0x17b   :  { %v1840_v46 = vadd.f32 %v1839_v55, %v1742_v34  ;;  %v1743_v38 = vmul.f32 %v4174_v16, %v1655_v19  ;;  %v2459_v63 = vpop.eup %2458  ;;  %2466 = vrcp.f32 %v1225_v48  ;;  %v1240_v22 = vadd.f32 1.0, %v2457_v26  ;;  %v4179_v55 = vld [vmem:[#allocation21_spill] sm:$0xff] }
 0x17c   :  { %v1831_v44 = vadd.f32 %v1830_v52, %v1741_v42  ;;  %v4176_v35 = vmax.f32 %v4175_v58, 0.0  ;;  %2468 = vrcp.f32 %v1227_v10  ;;  %v1242_v11 = vadd.f32 1.0, %v2459_v63  ;;  %v4187_v42 = vld [vmem:[#allocation38_spill] sm:$0xff]  ;;  %v4188_v10 = vld [vmem:[#allocation40_spill] sm:$0xff] }
 0x17d   :  { %v2461_v37 = vpop.eup %2460  ;;  %v1849_v9 = vadd.f32 %v1848_v47, %v1743_v38  ;;  %v4178_v18 = vmax.f32 %v4177_v59, 0.0  ;;  %2470 = vrcp.f32 %v1240_v22  ;;  %v4180_v2 = vmax.f32 %v4179_v55, 0.0 }
 0x17e   :  { %v1703_v3 = vmul.f32 %v3326_v43, %v4176_v35  ;;  %v1241_v56 = vadd.f32 1.0, %v2461_v37  ;;  %v4182_v12 = vmax.f32 %v4181_v13, 0.0  ;;  %2472 = vrcp.f32 %v1242_v11 }
 0x17f   :  { %v1717_v49 = vmul.f32 %v4173_v5, %v4178_v18  ;;  %v1687_v61 = vmul.f32 %v3318_v41, %v4180_v2  ;;  %v4184_v36 = vmax.f32 %v4183_v40, 0.0  ;;  %v4186_v47 = vmax.f32 %v4185_v7, 0.0  ;;  %v4191_v18 = vld [vmem:[#allocation43_spill] sm:$0xff] }
 0x180   :  { %v1719_v52 = vmul.f32 %v4173_v5, %v4182_v12  ;;  %v1757_v19 = vadd.f32 %v3726_v28, %v3717_v20  ;;  %v1823_v45 = vrot.slane %v1822_v21, 4  ;;  %2474 = vrcp.f32 %v1241_v56 }
 0x181   :  { %v1733_v57 = vmul.f32 %v4174_v16, %v4184_v36  ;;  %v1735_v34 = vmul.f32 %v4174_v16, %v4186_v47  ;;  %v1775_v54 = vadd.f32 %v1703_v3, %v1687_v61  ;;  %v1789_v48 = vrot.slane %v4187_v42, 2  ;;  %v4189_v3 = vld [vmem:[#allocation39_spill] sm:$0xff] }
 0x182   :  { %v1841_v26 = vrot.slane %v1840_v46, 4  ;;  %2476 = vpow2.f32 %v3585_v60  ;;  %v1758_v38 = vadd.f32 %v1757_v19, %v1717_v49  ;;  %v1798_v63 = vrot.slane %v4188_v10, 2  ;;  %v4190_v60 = vld [vmem:[#allocation7_spill] sm:$0xff] }
 0x183   :  { %v1832_v22 = vrot.slane %v1831_v44, 4  ;;  %2478 = vpow2.f32 %v3588_v6  ;;  %v1776_v58 = vadd.f32 %v1775_v54, %v1719_v52  ;;  %v1790_v35 = vadd.f32 %v1789_v48, %v4187_v42  ;;  %v3768_v11 = vpop.eup %2462 }
 0x184   :  { %2480 = vpow2.f32 %v3590_v14  ;;  %v1759_v20 = vadd.f32 %v1758_v38, %v1733_v57  ;;  %v1799_v28 = vadd.f32 %v1798_v63, %v4188_v10  ;;  %v1807_v37 = vrot.slane %v4189_v3, 2  ;;  %v3775_v56 = vpop.eup %2464  ;;  %v4192_v14 = vld [vmem:[#allocation44_spill] sm:$0xff] }
 0x185   :  { %v1850_v59 = vrot.slane %v1849_v9, 4  ;;  %2482 = vpow2.f32 %v4190_v60  ;;  %v3773_v49 = vadd.f32 %v4191_v18, %v2985_v17  ;;  %v1777_v6 = vadd.f32 %v1776_v58, %v1735_v34  ;;  %v3782_v13 = vpop.eup %2466 }
 0x186   :  { %2484 = vpow2.f32 %v3607_v53  ;;  %v3780_v55 = vadd.f32 %v4192_v14, %v2985_v17  ;;  %v1760_v2 = vrot.slane %v1759_v20, 4  ;;  %v1791_v61 = vrot.slane %v1790_v35, 1  ;;  %v3785_v36 = vpop.eup %2468 }
 0x187   :  { %v1824_v12 = vadd.f32 %v1823_v45, %v1822_v21  ;;  %2486 = vpow2.f32 %v3609_v4  ;;  %v1778_v52 = vrot.slane %v1777_v6, 4  ;;  %v1800_v40 = vrot.slane %v1799_v28, 1  ;;  %v3791_v17 = vpop.eup %2470  ;;  %v4193_v4 = vld [vmem:[#allocation41_spill] sm:$0xff] }
 0x188   :  { %v3787_v57 = vadd.f32 %v1841_v26, %v1840_v46  ;;  %v1833_v7 = vadd.f32 %v1832_v22, %v1831_v44  ;;  %2488 = vpow2.f32 %v3611_v29  ;;  %v1808_v53 = vadd.f32 %v1807_v37, %v4189_v3  ;;  %v3798_v19 = vpop.eup %2472 }
 0x189   :  { %v3793_v47 = vadd.f32 %v1850_v59, %v1849_v9  ;;  %v1480_v34 = vsub.f32 1.0, %v3768_v11  ;;  %2490 = vpow2.f32 %v3625_v50  ;;  %v1816_v21 = vrot.slane %v4193_v4, 2 }
 0x18a   :  { %v1482_v46 = vsub.f32 1.0, %v3775_v56  ;;  %2492 = vpow2.f32 %v3627_v32  ;;  %v3802_v44 = vadd.f32 %v1760_v2, %v1759_v20  ;;  %v3804_v29 = vadd.f32 %v1791_v61, %v1790_v35  ;;  %v3806_v45 = vpop.eup %2474 }
 0x18b   :  { %v1481_v9 = vsub.f32 1.0, %v3782_v13  ;;  %2494 = vtanh.f32 %v3617_v30  ;;  %v3810_v54 = vadd.f32 %v1778_v52, %v1777_v6  ;;  %v3812_v50 = vadd.f32 %v1800_v40, %v1799_v28 }
 0x18c   :  { %v2477_v42 = vpop.eup %2476  ;;  %v1483_v48 = vsub.f32 1.0, %v3785_v36  ;;  %v1496_v26 = vsub.f32 1.0, %v3791_v17  ;;  %2496 = vtanh.f32 %v3621_v31  ;;  %v1809_v32 = vrot.slane %v1808_v53, 1 }
 0x18d   :  { %v2479_v38 = vpop.eup %2478  ;;  %v1243_v10 = vadd.f32 1.0, %v2477_v42  ;;  %2498 = vtanh.f32 %v3634_v39  ;;  %v1817_v63 = vadd.f32 %v1816_v21, %v4193_v4  ;;  %v1825_v22 = vrot.slane %v1824_v12, 2 }
 0x18e   :  { %v2481_v30 = vpop.eup %2480  ;;  %v1498_v58 = vsub.f32 1.0, %v3798_v19  ;;  %v1256_v35 = vadd.f32 1.0, %v2479_v38  ;;  %2500 = vtanh.f32 %v3638_v62  ;;  %v1762_v20 = vrot.slane %v3802_v44, 2 }
 0x18f   :  { %v2483_v28 = vpop.eup %2482  ;;  %2502 = vrcp.f32 %v1243_v10  ;;  %v1258_v3 = vadd.f32 1.0, %v2481_v30  ;;  %v1780_v31 = vrot.slane %v3810_v54, 2  ;;  %v1826_v37 = vadd.f32 %v1825_v22, %v1824_v12 }
 0x190   :  { %v2485_v59 = vpop.eup %2484  ;;  %2504 = vrcp.f32 %v1256_v35  ;;  %v1257_v39 = vadd.f32 1.0, %v2483_v28  ;;  %v3823_v60 = vadd.f32 %v1809_v32, %v1808_v53  ;;  %v1834_v18 = vrot.slane %v1833_v7, 2 }
 0x191   :  { %v2487_v6 = vpop.eup %2486  ;;  %2506 = vrcp.f32 %v1258_v3  ;;  %v1259_v14 = vadd.f32 1.0, %v2485_v59  ;;  %v1818_v2 = vrot.slane %v1817_v63, 1  ;;  %v1827_v61 = vrot.slane %v1826_v37, 1 }
 0x192   :  { %v2489_v62 = vpop.eup %2488  ;;  %2508 = vrcp.f32 %v1257_v39  ;;  %v1272_v52 = vadd.f32 1.0, %v2487_v6  ;;  %v1835_v40 = vadd.f32 %v1834_v18, %v1833_v7  ;;  %v1843_v4 = vrot.slane %v3787_v57, 2 }
 0x193   :  { %v2491_v21 = vpop.eup %2490  ;;  %v1497_v12 = vsub.f32 1.0, %v3806_v45  ;;  %2510 = vrcp.f32 %v1259_v14  ;;  %v1274_v42 = vadd.f32 1.0, %v2489_v62  ;;  %v1852_v53 = vrot.slane %v3793_v47, 2 }
 0x194   :  { %v2493_v32 = vpop.eup %2492  ;;  %2512 = vrcp.f32 %v1272_v52  ;;  %v1273_v38 = vadd.f32 1.0, %v2491_v21  ;;  %v1836_v10 = vrot.slane %v1835_v40, 1  ;;  %v1844_v22 = vadd.f32 %v1843_v4, %v3787_v57 }
 0x195   :  { %v2495_v30 = vpop.eup %2494  ;;  %2514 = vrcp.f32 %v1274_v42  ;;  %v1275_v35 = vadd.f32 1.0, %v2493_v32  ;;  %v1819_v28 = vadd.f32 %v1818_v2, %v1817_v63  ;;  %v1853_v7 = vadd.f32 %v1852_v53, %v3793_v47 }
 0x196   :  { %v2497_v3 = vpop.eup %2496  ;;  %2516 = vrcp.f32 %v1273_v38  ;;  %v1544_v59 = vmul.f32 %v2495_v30, %v1480_v34  ;;  %v1828_v39 = vadd.f32 %v1827_v61, %v1826_v37  ;;  %v1845_v18 = vrot.slane %v1844_v22, 1 }
 0x197   :  { %v2499_v6 = vpop.eup %2498  ;;  %2518 = vrcp.f32 %v1275_v35  ;;  %v1546_v14 = vmul.f32 %v2497_v3, %v1482_v46  ;;  %v1854_v62 = vrot.slane %v1853_v7, 1  ;;  %v3837_v57 = vstv %s4061_s3  ;;  %s2587_s3 = smov [#allocation3]  }
 0x198   :  { %v2501_v63 = vpop.eup %2500  ;;  %v1608_v47 = vmax.f32 %v1544_v59, 0.0  ;;  %v1545_v2 = vmul.f32 %v2499_v6, %v1481_v9  ;;  %2520 = vtanh.f32 %v3647_v25  ;;  %v1837_v11 = vadd.f32 %v1836_v10, %v1835_v40  ;;  %s2034_s8 = sshll.u32 %s2587_s3, 4  ;;  %s2035_s8 = int_to_ptr.vmem [resolvable:$true] %s2034_s8 }
 0x199   :  { %v3842_v34 = vpop.eup %2502  ;;  %v1610_v37 = vmax.f32 %v1546_v14, 0.0  ;;  %v1547_v56 = vmul.f32 %v2501_v63, %v1483_v48  ;;  %2522 = vtanh.f32 %v3651_v24  ;;  %v1846_v46 = vadd.f32 %v1845_v18, %v1844_v22  ;;  %s2560_s9 = scalar_lea.vmem %s2035_s8, 256  ;;  %p2565_p1 = scmp.lt.s32.totalorder %s2035_s8, %s2035_s8 }
 0x19a   :  { %v3847_v61 = vpop.eup %2504  ;;  %v1499_v52 = vsub.f32 1.0, %v3842_v34  ;;  %v1609_v4 = vmax.f32 %v1545_v2, 0.0  ;;  %2524 = vtanh.f32 %v3656_v0  ;;  %v1855_v13 = vadd.f32 %v1854_v62, %v1853_v7  ;;  %p2561_p0 = scmp.ne.s32.totalorder %s2035_s8, %s2560_s9  ;;  %p2566_p2 = scmp.lt.s32.totalorder %s2560_s9, %s2560_s9 }
 0x19b   :  { %v3851_v9 = vpop.eup %2506  ;;  %v1512_v25 = vsub.f32 1.0, %v3847_v61  ;;  %v3855_v40 = vmul.f32 %v3318_v41, %v1608_v47  ;;  %v1611_v36 = vmax.f32 %v1547_v56, 0.0  ;;  %2526 = vtanh.f32 %v3660_v33  ;;  %v4196_v61 = vld [vmem:[#allocation16_spill] sm:$0xff] }
 0x19c   :  { %v3858_v24 = vpop.eup %2508  ;;  %v1514_v48 = vsub.f32 1.0, %v3851_v9  ;;  %v3862_v21 = vmul.f32 %v3318_v41, %v1610_v37  ;;  %v3865_v0 = vmul.f32 %v3318_v41, %v1609_v4  ;;  %2528 = vtanh.f32 %v3669_v15  ;;  %v4195_v37 = vld [vmem:[#allocation15_spill] sm:$0xff]  ;;  %p2567_p3 = por %p2566_p2, %p2565_p1 }
 0x19d   :  { %v3868_v42 = vpop.eup %2510  ;;  %v1513_v53 = vsub.f32 1.0, %v3858_v24  ;;  %v3872_v32 = vmul.f32 %v3318_v41, %v1611_v36  ;;  %2530 = vtanh.f32 %v3674_v1  ;;  %v3877_v33 = vadd.f32 %v3837_v57, %v3804_v29 }
 0x19e   :  { %v3879_v38 = vpop.eup %2512  ;;  %v1515_v10 = vsub.f32 1.0, %v3868_v42  ;;  %2532 = vtanh.f32 %v3678_v8  ;;  %v3885_v15 = vadd.f32 %v3837_v57, %v3812_v50  ;;  %v3889_v22 = vadd.f32 %v3837_v57, %v3823_v60  ;;  %p2568_p4 = pnand %p2567_p3, %p2561_p0 }
 0x19f   :  { %v3891_v30 = vpop.eup %2514  ;;  %v1528_v1 = vsub.f32 1.0, %v3879_v38  ;;  %2534 = vtanh.f32 %v3688_v27  ;;  %v3896_v29 = vadd.f32 %v3837_v57, %v1819_v28  ;;  %v3899_v35 = vadd.f32 %v3837_v57, %v1828_v39 }
 0x1a0   :  { %v3901_v8 = vpop.eup %2516  ;;  %v1530_v50 = vsub.f32 1.0, %v3891_v30  ;;  %2536 = vtanh.f32 %v3698_v51  ;;  %v3906_v60 = vadd.f32 %v3837_v57, %v1837_v11  ;;  %v3909_v7 = vadd.f32 %v3837_v57, %v1846_v46  ;;  %v4194_v11 = vld [vmem:[#allocation13_spill] sm:$0xff] }
 0x1a1   :  { %v3911_v3 = vpop.eup %2518  ;;  %v1529_v27 = vsub.f32 1.0, %v3901_v8  ;;  %2538 = vtanh.f32 %v3706_v23  ;;  %v3916_v28 = vadd.f32 %v3837_v57, %v1855_v13  ;;  %v1928_v59 = vcombine.low %v3877_v33, %v3885_v15 }
 0x1a2   :  { %v2521_v39 = vpop.eup %2520  ;;  %v1531_v51 = vsub.f32 1.0, %v3911_v3  ;;  %2540 = vtanh.f32 %v3773_v49  ;;  %v1929_v18 = vcombine.low %v3889_v22, %v3896_v29  ;;  %v2586_v23 = vmov 1966171168   ;;  %v4201_v3 = vld [vmem:[#allocation28_spill] sm:$0xff] }
 0x1a3   :  { %v2523_v6 = vpop.eup %2522  ;;  %v1560_v14 = vmul.f32 %v2521_v39, %v1496_v26  ;;  %2542 = vtanh.f32 %v3780_v55  ;;  %v3927_v62 = vunpack.c.l.s4 %v2586_v23  ;;  %v1933_v63 = vlaneseq }
 0x1a4   :  { %v2525_v47 = vpop.eup %2524  ;;  %v1562_v2 = vmul.f32 %v2523_v6, %v1498_v58  ;;  %2544 = vtanh.f32 %v4194_v11  ;;  %v1975_v49 = vcombine.low %v3899_v35, %v3906_v60  ;;  %v1976_v34 = vcombine.low %v3909_v7, %v3916_v28  ;;  %v4197_v6 = vld [vmem:[#allocation18_spill] sm:$0xff] }
 0x1a5   :  { %v2527_v17 = vpop.eup %2526  ;;  %v1624_v26 = vmax.f32 %v1560_v14, 0.0  ;;  %v1561_v55 = vmul.f32 %v2525_v47, %v1497_v12  ;;  %2546 = vtanh.f32 %v4195_v37  ;;  %v1932_v56 = vunpack.c.0.s8 %v3927_v62  ;;  %v4198_v47 = vld [vmem:[#allocation17_spill] sm:$0xff] }
 0x1a6   :  { %v2529_v46 = vpop.eup %2528  ;;  %v1626_v19 = vmax.f32 %v1562_v2, 0.0  ;;  %v1563_v58 = vmul.f32 %v2527_v17, %v1499_v52  ;;  %2548 = vtanh.f32 %v4196_v61  ;;  %v3941_v4 = vshrl.u32 %v1933_v63, 7 }
 0x1a7   :  { %v2531_v13 = vpop.eup %2530  ;;  %v1712_v9 = vmul.f32 %v3326_v43, %v1624_v26  ;;  %v1625_v36 = vmax.f32 %v1561_v55, 0.0  ;;  %v1576_v39 = vmul.f32 %v2529_v46, %v1512_v25  ;;  %2550 = vtanh.f32 %v4197_v6 }
 0x1a8   :  { %v2533_v45 = vpop.eup %2532  ;;  %v1714_v12 = vmul.f32 %v3326_v43, %v1626_v19  ;;  %v1627_v14 = vmax.f32 %v1563_v58, 0.0  ;;  %v1578_v23 = vmul.f32 %v2531_v13, %v1514_v48  ;;  %2552 = vtanh.f32 %v4198_v47 }
 0x1a9   :  { %v2535_v2 = vpop.eup %2534  ;;  %v1856_v52 = vadd.f32 %v1712_v9, %v3855_v40  ;;  %v1713_v63 = vmul.f32 %v3326_v43, %v1625_v36  ;;  %v1640_v11 = vmax.f32 %v1576_v39, 0.0  ;;  %v1577_v17 = vmul.f32 %v2533_v45, %v1513_v53 }
 0x1aa   :  { %v2537_v26 = vpop.eup %2536  ;;  %v1874_v25 = vadd.f32 %v1714_v12, %v3862_v21  ;;  %v1715_v55 = vmul.f32 %v3326_v43, %v1627_v14  ;;  %v1642_v37 = vmax.f32 %v1578_v23, 0.0  ;;  %v1579_v48 = vmul.f32 %v2535_v2, %v1515_v10  ;;  %v4199_v23 = vld [vmem:[#allocation23_spill] sm:$0xff] }
 0x1ab   :  { %v2539_v46 = vpop.eup %2538  ;;  %v1865_v19 = vadd.f32 %v1713_v63, %v3865_v0  ;;  %v1728_v40 = vmul.f32 %v4173_v5, %v1640_v11  ;;  %v1641_v58 = vmax.f32 %v1577_v17, 0.0  ;;  %v1592_v61 = vmul.f32 %v2537_v26, %v1528_v1 }
 0x1ac   :  { %v2541_v24 = vpop.eup %2540  ;;  %v1883_v53 = vadd.f32 %v1715_v55, %v3872_v32  ;;  %v1730_v21 = vmul.f32 %v4173_v5, %v1642_v37  ;;  %v1643_v13 = vmax.f32 %v1579_v48, 0.0  ;;  %v1594_v9 = vmul.f32 %v2539_v46, %v1530_v50  ;;  %v4204_v46 = vld [vmem:[#allocation9_spill] sm:$0xff] }
 0x1ad   :  { %v2543_v42 = vpop.eup %2542  ;;  %v1857_v10 = vadd.f32 %v1856_v52, %v1728_v40  ;;  %v1729_v36 = vmul.f32 %v4173_v5, %v1641_v58  ;;  %v1656_v0 = vmax.f32 %v1592_v61, 0.0  ;;  %v1593_v39 = vmul.f32 %v2541_v24, %v1529_v27  ;;  %v4200_v52 = vld [vmem:[#allocation27_spill] sm:$0xff]  ;;  %v4206_v58 = vld [vmem:[#allocation10_spill] sm:$0xff] }
 0x1ae   :  { %v2545_v6 = vpop.eup %2544  ;;  %v1875_v38 = vadd.f32 %v1874_v25, %v1730_v21  ;;  %v1731_v1 = vmul.f32 %v4173_v5, %v1643_v13  ;;  %v1658_v45 = vmax.f32 %v1594_v9, 0.0  ;;  %v1595_v32 = vmul.f32 %v2543_v42, %v1531_v51  ;;  %v4202_v51 = vld [vmem:[#allocation8_spill] sm:$0xff]  ;;  %v4208_v13 = vld [vmem:[#allocation11_spill] sm:$0xff] }
 0x1af   :  { %v2547_v12 = vpop.eup %2546  ;;  %v1866_v14 = vadd.f32 %v1865_v19, %v1729_v36  ;;  %v1744_v30 = vmul.f32 %v4174_v16, %v1656_v0  ;;  %v1657_v50 = vmax.f32 %v1593_v39, 0.0  ;;  %2554 = vtanh.f32 %v4199_v23 }
 0x1b0   :  { %v2549_v47 = vpop.eup %2548  ;;  %v1884_v2 = vadd.f32 %v1883_v53, %v1731_v1  ;;  %v1746_v8 = vmul.f32 %v4174_v16, %v1658_v45  ;;  %v1659_v27 = vmax.f32 %v1595_v32, 0.0  ;;  %2556 = vtanh.f32 %v4200_v52 }
 0x1b1   :  { %v2551_v63 = vpop.eup %2550  ;;  %v1858_v11 = vadd.f32 %v1857_v10, %v1744_v30  ;;  %v1745_v17 = vmul.f32 %v4174_v16, %v1657_v50  ;;  %2558 = vtanh.f32 %v4201_v3  ;;  %v4203_v26 = vsub.f32 1.0, %v4202_v51  ;;  %v4210_v10 = vld [vmem:[#allocation12_spill] sm:$0xff] }
 0x1b2   :  { %v2553_v55 = vpop.eup %2552  ;;  %v1876_v37 = vadd.f32 %v1875_v38, %v1746_v8  ;;  %v1747_v48 = vmul.f32 %v4174_v16, %v1659_v27  ;;  %v4205_v19 = vsub.f32 1.0, %v4204_v46  ;;  %v4207_v61 = vsub.f32 1.0, %v4206_v58 }
 0x1b3   :  { %v1532_v25 = vmul.f32 %v2545_v6, %v4203_v26  ;;  %v1859_v53 = vrot.slane %v1858_v11, 4  ;;  %v1867_v21 = vadd.f32 %v1866_v14, %v1745_v17  ;;  %v4209_v9 = vsub.f32 1.0, %v4208_v13 }
 0x1b4   :  { %v1534_v40 = vmul.f32 %v2547_v12, %v4205_v19  ;;  %v1548_v24 = vmul.f32 %v2549_v47, %v4207_v61  ;;  %v4211_v36 = vsub.f32 1.0, %v4210_v10  ;;  %v1877_v39 = vrot.slane %v1876_v37, 4 }
 0x1b5   :  { %v1550_v42 = vmul.f32 %v2551_v63, %v4209_v9  ;;  %v1885_v6 = vadd.f32 %v1884_v2, %v1747_v48  ;;  %v1596_v1 = vmax.f32 %v1532_v25, 0.0  ;;  %v1860_v45 = vadd.f32 %v1859_v53, %v1858_v11 }
 0x1b6   :  { %v1564_v0 = vmul.f32 %v2553_v55, %v4211_v36  ;;  %v1598_v38 = vmax.f32 %v1534_v40, 0.0  ;;  %v1868_v32 = vrot.slane %v1867_v21, 4  ;;  %v1612_v30 = vmax.f32 %v1548_v24, 0.0  ;;  %v4214_v24 = vld [vmem:[#allocation19_spill] sm:$0xff] }
 0x1b7   :  { %v1614_v50 = vmax.f32 %v1550_v42, 0.0  ;;  %v1878_v12 = vadd.f32 %v1877_v39, %v1876_v37  ;;  %v1886_v23 = vrot.slane %v1885_v6, 4  ;;  %v1684_v47 = vmul.f32 %v3318_v41, %v1596_v1 }
 0x1b8   :  { %v1628_v8 = vmax.f32 %v1564_v0, 0.0  ;;  %v1869_v14 = vadd.f32 %v1868_v32, %v1867_v21  ;;  %v1686_v27 = vmul.f32 %v3318_v41, %v1598_v38  ;;  %v1700_v52 = vmul.f32 %v3326_v43, %v1612_v30  ;;  %v4212_v41 = vld [vmem:[#allocation14_spill] sm:$0xff] }
 0x1b9   :  { %v1702_v63 = vmul.f32 %v3326_v43, %v1614_v50  ;;  %v1887_v17 = vadd.f32 %v1886_v23, %v1885_v6  ;;  %v1861_v3 = vrot.slane %v1860_v45, 2  ;;  %v1879_v11 = vrot.slane %v1878_v12, 2  ;;  %v2555_v51 = vpop.eup %2554 }
 0x1ba   :  { %v1716_v2 = vmul.f32 %v4173_v5, %v1628_v8  ;;  %v1748_v26 = vadd.f32 %v1700_v52, %v1684_v47  ;;  %v1870_v55 = vrot.slane %v1869_v14, 2  ;;  %v3994_v37 = vsub.s32 %v1932_v56, %v3941_v4  ;;  %v2557_v48 = vpop.eup %2556  ;;  %v4216_v56 = vld [vmem:[#allocation29_spill] sm:$0xff] }
 0x1bb   :  { %v1766_v25 = vadd.f32 %v1702_v63, %v1686_v27  ;;  %v4213_v46 = vsub.f32 1.0, %v4212_v41  ;;  %v1862_v40 = vadd.f32 %v1861_v3, %v1860_v45  ;;  %v1880_v43 = vadd.f32 %v1879_v11, %v1878_v12  ;;  %v2559_v61 = vpop.eup %2558 }
 0x1bc   :  { %v1888_v58 = vrot.slane %v1887_v17, 2  ;;  %v4215_v53 = vsub.f32 1.0, %v4214_v24  ;;  %v1749_v13 = vadd.f32 %v1748_v26, %v1716_v2  ;;  %v1871_v9 = vadd.f32 %v1870_v55, %v1869_v14 }
 0x1bd   :  { %v1566_v19 = vmul.f32 %v2555_v51, %v4213_v46  ;;  %v4004_v62 = vrot.slane %v1928_v59, %v3994_v37  ;;  %v4217_v4 = vsub.f32 1.0, %v4216_v56  ;;  %v1863_v36 = vrot.slane %v1862_v40, 1 }
 0x1be   :  { %v1580_v21 = vmul.f32 %v2557_v48, %v4215_v53  ;;  %v1881_v0 = vrot.slane %v1880_v43, 1  ;;  %v1872_v6 = vrot.slane %v1871_v9, 1  ;;  %v1889_v1 = vadd.f32 %v1888_v58, %v1887_v17 }
 0x1bf   :  { %v1582_v42 = vmul.f32 %v2559_v61, %v4217_v4  ;;  %v1630_v10 = vmax.f32 %v1566_v19, 0.0  ;;  %v1957_v38 = vrot.slane %v1929_v18, %v3994_v37  ;;  %v1864_v33 = vadd.f32 %v1863_v36, %v1862_v40 }
 0x1c0   :  { %v1644_v39 = vmax.f32 %v1580_v21, 0.0  ;;  %v1882_v15 = vadd.f32 %v1881_v0, %v1880_v43  ;;  %v1873_v30 = vadd.f32 %v1872_v6, %v1871_v9  ;;  %v1890_v50 = vrot.slane %v1889_v1, 1 }
 0x1c1   :  { %v1646_v45 = vmax.f32 %v1582_v42, 0.0  ;;  %v1718_v32 = vmul.f32 %v4173_v5, %v1630_v10  ;;  %v1959_v12 = vcombine.low %v4004_v62, %v1957_v38  ;;  %v1763_v8 = vadd.f32 %v1762_v20, %v3802_v44 }
 0x1c2   :  { %v1732_v59 = vmul.f32 %v4174_v16, %v1644_v39  ;;  %v1906_v22 = vadd.f32 %v3837_v57, %v1864_v33  ;;  %v1891_v18 = vadd.f32 %v1890_v50, %v1889_v1  ;;  %v1907_v5 = vadd.f32 %v3837_v57, %v1873_v30 }
 0x1c3   :  { %v1734_v23 = vmul.f32 %v4174_v16, %v1646_v45  ;;  %v1767_v47 = vadd.f32 %v1766_v25, %v1718_v32  ;;  %v1908_v14 = vadd.f32 %v3837_v57, %v1882_v15  ;;  %v1781_v52 = vadd.f32 %v1780_v31, %v3810_v54 }
 0x1c4   :  { %v1750_v29 = vadd.f32 %v1749_v13, %v1732_v59  ;;  %v1985_v16 = vrot.slane %v1975_v49, %v3994_v37  ;;  %v1992_v44 = vrot.slane %v1976_v34, %v3994_v37  ;;  %v1909_v63 = vadd.f32 %v3837_v57, %v1891_v18 }
 0x1c5   :  { %v1768_v27 = vadd.f32 %v1767_v47, %v1734_v23  ;;  %v1977_v17 = vcombine.low %v1906_v22, %v1907_v5  ;;  %v1764_v51 = vrot.slane %v1763_v8, 1  ;;  %v1782_v25 = vrot.slane %v1781_v52, 1 }
 0x1c6   :  { %v1751_v20 = vrot.slane %v1750_v29, 4  ;;  %v2007_v3 = vcombine.low %v1985_v16, %v1992_v44  ;;  %v1978_v26 = vcombine.low %v1908_v14, %v1909_v63  ;;  %v1973_v10 = vrot.slane %v1959_v12, %v3994_v37 }
 0x1c7   :  { %v1769_v2 = vrot.slane %v1768_v27, 4  ;;  %v1999_v54 = vrot.slane %v1977_v17, %v3994_v37  ;;  %v1765_v7 = vadd.f32 %v1764_v51, %v1763_v8  ;;  %v1783_v48 = vadd.f32 %v1782_v25, %v1781_v52 }
 0x1c8   :  { %v1752_v11 = vadd.f32 %v1751_v20, %v1750_v29  ;;  %v2006_v60 = vrot.slane %v1978_v26, %v3994_v37  ;;  %v2015_v46 = vrot.slane %v2007_v3, %v3994_v37 }
 0x1c9   :  { %v1770_v31 = vadd.f32 %v1769_v2, %v1768_v27  ;;  %v1895_v58 = vadd.f32 %v3837_v57, %v1765_v7  ;;  %v1897_v53 = vadd.f32 %v3837_v57, %v1783_v48 }
 0x1ca   :  { %v1753_v35 = vrot.slane %v1752_v11, 2  ;;  %v2008_v28 = vcombine.low %v1999_v54, %v2006_v60 }
 0x1cb   :  { %v1771_v49 = vrot.slane %v1770_v31, 2 }
 0x1cc   :  { %v1754_v55 = vadd.f32 %v1753_v35, %v1752_v11  ;;  %v2022_v19 = vrot.slane %v2008_v28, %v3994_v37 }
 0x1cd   :  { %v1772_v34 = vadd.f32 %v1771_v49, %v1770_v31 }
 0x1ce   :  { %v1755_v41 = vrot.slane %v1754_v55, 1  ;;  %v2023_v61 = vcombine.low %v2015_v46, %v2022_v19 }
 0x1cf   :  { %v1773_v40 = vrot.slane %v1772_v34, 1 }
 0x1d0   :  { %v1756_v43 = vadd.f32 %v1755_v41, %v1754_v55  ;;  %2027 = vst [vmem:[#allocation3 + $0x8] sm:$0xff] %v2023_v61 }
 0x1d1   :  { %v1774_v24 = vadd.f32 %v1773_v40, %v1772_v34 }
 0x1d2   :  { %v1894_v21 = vadd.f32 %v3837_v57, %v1756_v43 }
 0x1d3   :  { %v1896_v13 = vadd.f32 %v3837_v57, %v1774_v24 }
 0x1d4   :  { %v1926_v9 = vcombine.low %v1894_v21, %v1895_v58 }
 0x1d5   :  { %v1927_v62 = vcombine.low %v1896_v13, %v1897_v53 }
 0x1d6   :  { %v1936_v56 = vrot.slane %v1926_v9, %v3994_v37 }
 0x1d7   :  { %v1943_v4 = vrot.slane %v1927_v62, %v3994_v37 }
 0x1d9   :  { %v1958_v42 = vcombine.low %v1936_v56, %v1943_v4 }
 0x1db   :  { %v1966_v36 = vrot.slane %v1958_v42, %v3994_v37 }
 0x1dd   :  { %v1974_v0 = vcombine.low %v1966_v36, %v1973_v10 }
 0x1df   :  { %2026 = vst [vmem:[#allocation3] sm:$0xff] %v1974_v0 }
 0x1e0   :  { %2571 = shalt.err (!%p2568_p4)
}
 0x1e1   :  { %s2572_s12 = scalar_lea.hbm %s4062_s4, 256 }
 0x1e2   :  { %p2573_p5 = scmp.ne.s32.totalorder %s4062_s4, %s2572_s12  ;;  %p2576_p6 = scmp.lt.u32.totalorder %s2572_s12, %s4062_s4 }
 0x1e4   :  { %p2578_p7 = pnand %p2576_p6, %p2573_p5 }
 0x1e6   :  { %2581 = shalt.err (!%p2578_p7)
}
 0x1e7   :  { %2037 = dma.vmem_to_hbm [thread:$0]  %s2035_s8, 256, %s4062_s4, [#allocation4]  }
 0x1e8   :  { %2582 = dma.done.wait [#allocation4], 256  }
 0x1e9   :  { %2583 = vsyncadd [#allocation4], 4294967040 }
 0x1ea   :  { %2041 = vsyncpa [#allocation4], 1 }

</bundles_post_ra>
